<compile_context>
chip_gen: v7x
topology: tpu7x:2x2x1
jax: 0.10.0
libtpu: 0.0.40
codegen_flags: <defaults>
</compile_context>

<pallas_src>
import jax
import jax.numpy as jnp
from jax.experimental import pallas as pl
from jax.experimental.pallas import tpu as pltpu


# -----------------------------------------------------------------------------
# Kernel 1: fused bidirectional encoder LSTM recurrence (input gates precomputed)
# -----------------------------------------------------------------------------
def encoder_kernel(ginf_ref, ginb_ref, mf_ref, mb_ref, whhf_ref, whhb_ref,
                   outf_ref, outb_ref, lastcf_ref, lastcb_ref,
                   hf_scr, cf_scr, hb_scr, cb_scr):
    chunk = pl.program_id(0)
    Tc = ginf_ref.shape[0]
    H = hf_scr.shape[-1]

    @pl.when(chunk == 0)
    def _():
        hf_scr[...] = jnp.zeros_like(hf_scr)
        cf_scr[...] = jnp.zeros_like(cf_scr)
        hb_scr[...] = jnp.zeros_like(hb_scr)
        cb_scr[...] = jnp.zeros_like(cb_scr)

    whh_f = whhf_ref[...]          # (H, 4H) bf16
    whh_b = whhb_ref[...]          # (H, 4H) bf16

    def cell(gin, h, c, m, whh):
        # gin already contains x @ W_ih + b (precomputed outside the kernel)
        gates = gin + jnp.dot(h.astype(jnp.bfloat16), whh,
                              preferred_element_type=jnp.float32)
        ig = jax.nn.sigmoid(gates[:, 0:H])
        fg = jax.nn.sigmoid(gates[:, H:2 * H])
        gg = jnp.tanh(gates[:, 2 * H:3 * H])
        og = jax.nn.sigmoid(gates[:, 3 * H:4 * H])
        c_new = fg * c + ig * gg
        h_new = og * jnp.tanh(c_new)
        keep = m > 0.0                               # (B,1) select, packed-seq semantics
        return jnp.where(keep, h_new, h), jnp.where(keep, c_new, c)

    def body(i, carry):
        hf, cf, hb, cb = carry
        # forward direction: local time i of the forward chunk
        mf = mf_ref[i]
        hf, cf = cell(ginf_ref[i], hf, cf, mf, whh_f)
        outf_ref[i] = hf * mf                        # pad positions -> 0
        # backward direction: local time Tc-1-i of the mirrored chunk
        j = Tc - 1 - i
        mb = mb_ref[j]
        hb, cb = cell(ginb_ref[j], hb, cb, mb, whh_b)
        outb_ref[j] = hb * mb
        return hf, cf, hb, cb

    hf, cf, hb, cb = jax.lax.fori_loop(
        0, Tc, body,
        (hf_scr[...], cf_scr[...], hb_scr[...], cb_scr[...]),
        unroll=True)

    hf_scr[...] = hf
    cf_scr[...] = cf
    hb_scr[...] = hb
    cb_scr[...] = cb
    lastcf_ref[...] = cf
    lastcb_ref[...] = cb


# -----------------------------------------------------------------------------
# Kernel 2: input-feed attention decoder recurrence (time-chunked)
# -----------------------------------------------------------------------------
def decoder_kernel(giny_ref, srcatt_ref, srcenc_ref, bias_ref, h0_ref, c0_ref,
                   wihatt_ref, whh_ref, wvh_ref, wvc_ref,
                   attout_ref, h_scr, c_scr, ap_scr):
    chunk = pl.program_id(0)
    Tc = giny_ref.shape[0]
    H = h_scr.shape[-1]

    @pl.when(chunk == 0)
    def _():
        c_scr[...] = c0_ref[...]
        h_scr[...] = h0_ref[...]
        ap_scr[...] = jnp.zeros_like(ap_scr)

    srcatt = srcatt_ref[...]       # (B, S, H)  bf16   (att_src_linear, hoisted)
    srcenc = srcenc_ref[...]       # (B, S, 2H) bf16
    bias = bias_ref[...]           # (B, S)     f32    additive pad mask (0 / -1e30)
    wih_att = wihatt_ref[...]      # (H, 4H)    bf16   (input-feed half of W_ih)
    whh = whh_ref[...]             # (H, 4H)    bf16
    wvh = wvh_ref[...]             # (H, H)     bf16   (att_vec_linear, h half)
    wvc = wvc_ref[...]             # (2H, H)    bf16   (att_vec_linear, ctx half)

    def body(i, carry):
        h, c, ap = carry
        # gates: precomputed y-part + input-feed part + recurrent part (no concat)
        gates = (giny_ref[i]
                 + jnp.dot(ap.astype(jnp.bfloat16), wih_att,
                           preferred_element_type=jnp.float32)
                 + jnp.dot(h.astype(jnp.bfloat16), whh,
                           preferred_element_type=jnp.float32))
        ig = jax.nn.sigmoid(gates[:, 0:H])
        fg = jax.nn.sigmoid(gates[:, H:2 * H])
        gg = jnp.tanh(gates[:, 2 * H:3 * H])
        og = jax.nn.sigmoid(gates[:, 3 * H:4 * H])
        c_t = fg * c + ig * gg
        h_t = og * jnp.tanh(c_t)

        # dot-product attention as batched MXU matmuls (bmm form of the module)
        att_w = jnp.einsum('bsh,bqh->bsq', srcatt,
                           h_t[:, None, :].astype(jnp.bfloat16),
                           preferred_element_type=jnp.float32)[:, :, 0] + bias
        mmax = jnp.max(att_w, axis=-1, keepdims=True)
        e = jnp.exp(att_w - mmax)
        alpha = e / jnp.sum(e, axis=-1, keepdims=True)
        ctx = jnp.einsum('bqs,bsd->bqd',
                         alpha[:, None, :].astype(jnp.bfloat16), srcenc,
                         preferred_element_type=jnp.float32)[:, 0, :]

        att_t = jnp.tanh(
            jnp.dot(h_t.astype(jnp.bfloat16), wvh, preferred_element_type=jnp.float32)
            + jnp.dot(ctx.astype(jnp.bfloat16), wvc, preferred_element_type=jnp.float32))
        # TODO(synk): nn.Dropout(att_t) treated as identity (eval mode).
        attout_ref[i] = att_t
        return h_t, c_t, att_t

    h, c, ap = jax.lax.fori_loop(0, Tc, body,
                                 (h_scr[...], c_scr[...], ap_scr[...]),
                                 unroll=True)
    h_scr[...] = h
    c_scr[...] = c
    ap_scr[...] = ap


# -----------------------------------------------------------------------------
# Kernel 3: readout + log_softmax gather (no full logp materialized) + pad mask
#           accumulated over time chunks -> per-sentence log-likelihood
# -----------------------------------------------------------------------------
def make_score_kernel(pad_id):
    def score_kernel(att_ref, tgt_ref, wr_ref, scores_ref):
        @pl.when(pl.program_id(0) == 0)
        def _():
            scores_ref[...] = jnp.zeros_like(scores_ref)

        Tc, B, H = att_ref.shape
        att = att_ref[...].reshape(Tc * B, H)                     # chunked rows -> MXU
        tgt = tgt_ref[...].reshape(Tc * B, 1)                     # int32 gold ids
        logits = jnp.dot(att.astype(jnp.bfloat16), wr_ref[...],
                         preferred_element_type=jnp.float32)      # (Tc*B, V)
        m = jnp.max(logits, axis=-1, keepdims=True)
        lse = m + jnp.log(jnp.sum(jnp.exp(logits - m), axis=-1, keepdims=True))
        iota = jax.lax.broadcasted_iota(jnp.int32, logits.shape, 1)
        onehot = (iota == tgt).astype(jnp.float32)
        gold_logit = jnp.sum(logits * onehot, axis=-1, keepdims=True)
        gold = gold_logit - lse                                   # gathered log-prob
        notpad = (tgt != pad_id).astype(jnp.float32)
        contrib = (gold * notpad).reshape(Tc, B, 1)
        scores_ref[...] += jnp.sum(contrib, axis=0)               # (B, 1)
    return score_kernel


# -----------------------------------------------------------------------------
# Parameters (deterministic, shapes follow NMT.__init__; linears stored transposed;
# dec W_ih and att_vec_linear stored split so the kernel never concatenates).
# -----------------------------------------------------------------------------
def init_params(key, E, H, v_src, v_tgt, pad_id):
    ks = jax.random.split(key, 18)
    n = lambda k, shape: (0.1 * jax.random.normal(k, shape)).astype(jnp.float32)
    p = {
        'src_embed': n(ks[0], (v_src, E)).at[pad_id].set(0.0),
        'tgt_embed': n(ks[1], (v_tgt, E)).at[pad_id].set(0.0),
        # bidirectional encoder LSTM (combined b = b_ih + b_hh)
        'enc_wih_f': n(ks[2], (E, 4 * H)), 'enc_whh_f': n(ks[3], (H, 4 * H)),
        'enc_b_f': n(ks[4], (1, 4 * H)),
        'enc_wih_b': n(ks[5], (E, 4 * H)), 'enc_whh_b': n(ks[6], (H, 4 * H)),
        'enc_b_b': n(ks[7], (1, 4 * H)),
        # decoder LSTMCell (input_feed=True -> input dim E + H, stored split)
        'dec_wih_y': n(ks[8], (E, 4 * H)),     # acts on y_tm1_embed
        'dec_wih_att': n(ks[9], (H, 4 * H)),   # acts on att_tm1 (input feed)
        'dec_whh': n(ks[10], (H, 4 * H)),
        'dec_b': n(ks[11], (1, 4 * H)),
        'watt_src': n(ks[12], (2 * H, H)),     # att_src_linear (no bias)
        'wattvec_h': n(ks[13], (H, H)),        # att_vec_linear, h_t half
        'wattvec_c': n(ks[14], (2 * H, H)),    # att_vec_linear, ctx half
        'w_readout': n(ks[15], (H, v_tgt)),    # readout (no bias)
        'wci': n(ks[16], (2 * H, H)),          # decoder_cell_init
        'bci': n(ks[17], (1, H)),
    }
    return p


def _pad_time(x, t_pad, value):
    t = x.shape[0]
    if t == t_pad:
        return x
    pad_width = [(0, t_pad - t)] + [(0, 0)] * (x.ndim - 1)
    return jnp.pad(x, pad_width, constant_values=value)


# -----------------------------------------------------------------------------
# Forward pass (glue + Pallas kernels)
# -----------------------------------------------------------------------------
def nmt_forward(params, src_ids, src_lens, tgt_ids, pad_id,
                enc_chunk=4, dec_chunk=4):
    f32, bf16 = jnp.float32, jnp.bfloat16
    H = params['dec_whh'].shape[0]
    E = params['src_embed'].shape[1]
    H4 = 4 * H
    T_src, B = src_ids.shape

    # ------------------------------ encoder ---------------------------------
    Tc_e = enc_chunk
    T_pad = ((T_src + Tc_e - 1) // Tc_e) * Tc_e
    src_ids_p = _pad_time(src_ids, T_pad, pad_id)
    src_emb = params['src_embed'][src_ids_p]                       # (Tp, B, E) f32
    # packed-sequence step mask: 1.0 for real tokens, 0.0 for pads
    step_mask = (jnp.arange(T_pad)[:, None] < src_lens[None, :]
                 ).astype(f32)[..., None]                          # (Tp, B, 1)

    # hoisted input-gate projection for both directions at once (one big matmul)
    wih_fb = jnp.concatenate([params['enc_wih_f'], params['enc_wih_b']], axis=1)
    gin = jnp.dot(src_emb.reshape(-1, E).astype(bf16), wih_fb.astype(bf16),
                  preferred_element_type=f32).reshape(T_pad, B, 2 * H4)
    gin_f = gin[..., :H4] + params['enc_b_f']
    gin_b = gin[..., H4:] + params['enc_b_b']

    NC = T_pad // Tc_e
    fwd3 = lambda c: (c, 0, 0)
    bwd3 = lambda c: (NC - 1 - c, 0, 0)
    c2 = lambda c: (0, 0)

    out_f, out_b, lastc_f, lastc_b = pl.pallas_call(
        encoder_kernel,
        out_shape=(jax.ShapeDtypeStruct((T_pad, B, H), f32),
                   jax.ShapeDtypeStruct((T_pad, B, H), f32),
                   jax.ShapeDtypeStruct((B, H), f32),
                   jax.ShapeDtypeStruct((B, H), f32)),
        grid_spec=pltpu.PrefetchScalarGridSpec(
            num_scalar_prefetch=0,
            grid=(NC,),
            in_specs=[
                pl.BlockSpec((Tc_e, B, H4), fwd3),
                pl.BlockSpec((Tc_e, B, H4), bwd3),
                pl.BlockSpec((Tc_e, B, 1), fwd3),
                pl.BlockSpec((Tc_e, B, 1), bwd3),
                pl.BlockSpec((H, H4), c2),
                pl.BlockSpec((H, H4), c2),
            ],
            out_specs=[
                pl.BlockSpec((Tc_e, B, H), fwd3),
                pl.BlockSpec((Tc_e, B, H), bwd3),
                pl.BlockSpec((B, H), c2),
                pl.BlockSpec((B, H), c2),
            ],
            scratch_shapes=[pltpu.VMEM((B, H), f32) for _ in range(4)],
        ),
        compiler_params=pltpu.CompilerParams(
            dimension_semantics=("arbitrary",)),
    )(gin_f, gin_b, step_mask, step_mask,
      params['enc_whh_f'].astype(bf16), params['enc_whh_b'].astype(bf16))

    # (B, S, 2H) src encodings, batch-major like the module
    src_enc = jnp.transpose(jnp.concatenate([out_f, out_b], axis=-1), (1, 0, 2))

    # hoisted att_src_linear (one big matmul over all source positions)
    srcatt = jnp.dot(src_enc.reshape(-1, 2 * H).astype(bf16),
                     params['watt_src'].astype(bf16),
                     preferred_element_type=f32).reshape(B, T_pad, H)

    # decoder_cell_init (+ tanh) — tiny, plain XLA
    last_cell = jnp.concatenate([lastc_f, lastc_b], axis=-1)
    c0 = jnp.dot(last_cell, params['wci'], preferred_element_type=f32) + params['bci']
    h0 = jnp.tanh(c0)

    # additive attention bias: 0 at real positions, -1e30 at pad positions
    att_bias = jnp.where(jnp.arange(T_pad)[None, :] >= src_lens[:, None],
                         jnp.float32(-1e30), jnp.float32(0.0))     # (B, Tp)

    # ------------------------------ decoder ---------------------------------
    tgt_in = tgt_ids[:-1]
    Td = tgt_in.shape[0]
    Tc_d = dec_chunk
    Td_pad = ((Td + Tc_d - 1) // Tc_d) * Tc_d
    tgt_in_p = _pad_time(tgt_in, Td_pad, pad_id)
    tgt_emb = params['tgt_embed'][tgt_in_p]                        # (Tdp, B, E)

    # hoisted y-part of the decoder input-gate projection (+ bias)
    gin_y = (jnp.dot(tgt_emb.reshape(-1, E).astype(bf16),
                     params['dec_wih_y'].astype(bf16),
                     preferred_element_type=f32).reshape(Td_pad, B, H4)
             + params['dec_b'])

    ND = Td_pad // Tc_d
    tmap = lambda c: (c, 0, 0)
    c2d = lambda c: (0, 0)
    c3d = lambda c: (0, 0, 0)

    att_vecs = pl.pallas_call(
        decoder_kernel,
        out_shape=jax.ShapeDtypeStruct((Td_pad, B, H), f32),
        grid_spec=pltpu.PrefetchScalarGridSpec(
            num_scalar_prefetch=0,
            grid=(ND,),
            in_specs=[
                pl.BlockSpec((Tc_d, B, H4), tmap),
                pl.BlockSpec((B, T_pad, H), c3d),
                pl.BlockSpec((B, T_pad, 2 * H), c3d),
                pl.BlockSpec((B, T_pad), c2d),
                pl.BlockSpec((B, H), c2d),
                pl.BlockSpec((B, H), c2d),
                pl.BlockSpec((H, H4), c2d),
                pl.BlockSpec((H, H4), c2d),
                pl.BlockSpec((H, H), c2d),
                pl.BlockSpec((2 * H, H), c2d),
            ],
            out_specs=pl.BlockSpec((Tc_d, B, H), tmap),
            scratch_shapes=[pltpu.VMEM((B, H), f32) for _ in range(3)],
        ),
        compiler_params=pltpu.CompilerParams(
            dimension_semantics=("arbitrary",)),
    )(gin_y, srcatt.astype(bf16), src_enc.astype(bf16), att_bias, h0, c0,
      params['dec_wih_att'].astype(bf16), params['dec_whh'].astype(bf16),
      params['wattvec_h'].astype(bf16), params['wattvec_c'].astype(bf16))

    # ------------------------------- scores ---------------------------------
    tgt_gold = _pad_time(tgt_ids[1:], Td_pad, pad_id)[..., None].astype(jnp.int32)
    V = params['w_readout'].shape[1]
    scores = pl.pallas_call(
        make_score_kernel(pad_id),
        out_shape=jax.ShapeDtypeStruct((B, 1), f32),
        grid_spec=pltpu.PrefetchScalarGridSpec(
            num_scalar_prefetch=0,
            grid=(ND,),
            in_specs=[
                pl.BlockSpec((Tc_d, B, H), tmap),
                pl.BlockSpec((Tc_d, B, 1), tmap),
                pl.BlockSpec((H, V), c2d),
            ],
            out_specs=pl.BlockSpec((B, 1), c2d),
        ),
        compiler_params=pltpu.CompilerParams(
            dimension_semantics=("arbitrary",)),
    )(att_vecs, tgt_gold, params['w_readout'].astype(bf16))

    return scores[:, 0]                                            # (B,)


# -----------------------------------------------------------------------------
# Pure-JAX reference (same math, f32, no time padding) for validation
# -----------------------------------------------------------------------------
def reference_forward(params, src_ids, src_lens, tgt_ids, pad_id, H):
    f32 = jnp.float32
    src_emb = params['src_embed'][src_ids]
    T, B, E = src_emb.shape
    step_mask = (jnp.arange(T)[:, None] < src_lens[None, :]).astype(f32)[..., None]

    def lstm_dir(wih, whh, b, reverse):
        h = jnp.zeros((B, H), f32)
        c = jnp.zeros((B, H), f32)
        outs = [None] * T
        order = range(T - 1, -1, -1) if reverse else range(T)
        for t in order:
            x, m = src_emb[t], step_mask[t]
            gates = x @ wih + h @ whh + b
            i = jax.nn.sigmoid(gates[:, :H]); f = jax.nn.sigmoid(gates[:, H:2 * H])
            g = jnp.tanh(gates[:, 2 * H:3 * H]); o = jax.nn.sigmoid(gates[:, 3 * H:])
            cn = f * c + i * g
            hn = o * jnp.tanh(cn)
            h = m * hn + (1 - m) * h
            c = m * cn + (1 - m) * c
            outs[t] = h * m
        return jnp.stack(outs), c

    of, cf = lstm_dir(params['enc_wih_f'], params['enc_whh_f'], params['enc_b_f'], False)
    ob, cb = lstm_dir(params['enc_wih_b'], params['enc_whh_b'], params['enc_b_b'], True)
    src_enc = jnp.transpose(jnp.concatenate([of, ob], -1), (1, 0, 2))
    att_mask = (jnp.arange(T)[None, :] >= src_lens[:, None]).astype(f32)

    dec_wih = jnp.concatenate([params['dec_wih_y'], params['dec_wih_att']], axis=0)
    wattvec = jnp.concatenate([params['wattvec_h'], params['wattvec_c']], axis=0)

    c = jnp.concatenate([cf, cb], -1) @ params['wci'] + params['bci']
    h = jnp.tanh(c)
    srcatt = src_enc @ params['watt_src']
    tgt_emb = params['tgt_embed'][tgt_ids[:-1]]
    att_prev = jnp.zeros((B, H), f32)
    atts = []
    for t in range(tgt_emb.shape[0]):
        x = jnp.concatenate([tgt_emb[t], att_prev], -1)
        gates = x @ dec_wih + h @ params['dec_whh'] + params['dec_b']
        i = jax.nn.sigmoid(gates[:, :H]); f = jax.nn.sigmoid(gates[:, H:2 * H])
        g = jnp.tanh(gates[:, 2 * H:3 * H]); o = jax.nn.sigmoid(gates[:, 3 * H:])
        c = f * c + i * g
        h = o * jnp.tanh(c)
        aw = jnp.einsum('bsh,bh->bs', srcatt, h)
        aw = jnp.where(att_mask > 0.5, -jnp.inf, aw)
        alpha = jax.nn.softmax(aw, axis=-1)
        ctx = jnp.einsum('bs,bsd->bd', alpha, src_enc)
        att_t = jnp.tanh(jnp.concatenate([h, ctx], -1) @ wattvec)
        att_prev = att_t
        atts.append(att_t)
    att_vecs = jnp.stack(atts)
    logp = jax.nn.log_softmax(att_vecs @ params['w_readout'], axis=-1)
    gold = jnp.take_along_axis(logp, tgt_ids[1:][..., None], axis=-1)[..., 0]
    mask = (tgt_ids[1:] != pad_id).astype(f32)
    return (gold * mask).sum(0)


if __name__ == "__main__":
    E, H = 32, 32
    V_SRC, V_TGT = 48, 48
    PAD = 0
    B = 2
    T_SRC, T_TGT = 8, 7

    params = init_params(jax.random.PRNGKey(0), E, H, V_SRC, V_TGT, PAD)

    k1, k2 = jax.random.split(jax.random.PRNGKey(0), 2)
    src_lens = jnp.array([8, 6], dtype=jnp.int32)          # sorted desc (packed-seq req)
    src_ids = jax.random.randint(k1, (T_SRC, B), 1, V_SRC, dtype=jnp.int32)
    src_ids = jnp.where(jnp.arange(T_SRC)[:, None] < src_lens[None, :], src_ids, PAD)

    tgt_lens = jnp.array([7, 5], dtype=jnp.int32)          # wrapped by <s> ... </s>
    tgt_ids = jax.random.randint(k2, (T_TGT, B), 1, V_TGT, dtype=jnp.int32)
    tgt_ids = jnp.where(jnp.arange(T_TGT)[:, None] < tgt_lens[None, :], tgt_ids, PAD)

    scores = nmt_forward(params, src_ids, src_lens, tgt_ids, PAD,
                         enc_chunk=4, dec_chunk=4)
    scores = jax.block_until_ready(scores)

    with jax.default_matmul_precision('highest'):
        ref = reference_forward(params, src_ids, src_lens, tgt_ids, PAD, H)
        ref = jax.block_until_ready(ref)

    assert scores.shape == (B,)
    assert bool(jnp.all(jnp.isfinite(scores)))
    assert bool(jnp.allclose(scores, ref, atol=2e-2, rtol=2e-2)), (scores, ref)
    print("KERNEL_OK")
</pallas_src>

<mosaic_0001>
module attributes {stable_mosaic.version = 11 : i64} {
  func.func @encoder_kernel(%arg0: i32, %arg1: memref<4x2x128xf32, #tpu.memory_space<vmem>>, %arg2: memref<4x2x128xf32, #tpu.memory_space<vmem>>, %arg3: memref<4x2x1xf32, #tpu.memory_space<vmem>>, %arg4: memref<4x2x1xf32, #tpu.memory_space<vmem>>, %arg5: memref<32x128xbf16, #tpu.memory_space<vmem>>, %arg6: memref<32x128xbf16, #tpu.memory_space<vmem>>, %arg7: memref<4x2x32xf32, #tpu.memory_space<vmem>>, %arg8: memref<4x2x32xf32, #tpu.memory_space<vmem>>, %arg9: memref<2x32xf32, #tpu.memory_space<vmem>>, %arg10: memref<2x32xf32, #tpu.memory_space<vmem>>, %arg11: memref<2x32xf32, #tpu.memory_space<vmem>>, %arg12: memref<2x32xf32, #tpu.memory_space<vmem>>, %arg13: memref<2x32xf32, #tpu.memory_space<vmem>>, %arg14: memref<2x32xf32, #tpu.memory_space<vmem>>) attributes {dimension_semantics = [#tpu.dimension_semantics<arbitrary>], iteration_bounds = array<i64: 2>, scalar_prefetch = 0 : i64, scratch_operands = 4 : i64, tpu.core_type = #tpu.core_type<tc>, window_params = [{transform_indices = @transform_0, window_bounds = array<i64: 4, 2, 128>}, {transform_indices = @transform_1, window_bounds = array<i64: 4, 2, 128>}, {transform_indices = @transform_2, window_bounds = array<i64: 4, 2, 1>}, {transform_indices = @transform_3, window_bounds = array<i64: 4, 2, 1>}, {pipeline_mode = #tpu.pipeline_mode<synchronous>, transform_indices = @transform_4, window_bounds = array<i64: 32, 128>}, {pipeline_mode = #tpu.pipeline_mode<synchronous>, transform_indices = @transform_5, window_bounds = array<i64: 32, 128>}, {transform_indices = @transform_6, window_bounds = array<i64: 4, 2, 32>}, {transform_indices = @transform_7, window_bounds = array<i64: 4, 2, 32>}, {pipeline_mode = #tpu.pipeline_mode<synchronous>, transform_indices = @transform_8, window_bounds = array<i64: 2, 32>}, {pipeline_mode = #tpu.pipeline_mode<synchronous>, transform_indices = @transform_9, window_bounds = array<i64: 2, 32>}]} {
    %c0_i32 = arith.constant 0 : i32
    %0 = arith.cmpi eq, %arg0, %c0_i32 : i32
    %1 = arith.extui %0 : i1 to i32
    %c0_i32_0 = arith.constant 0 : i32
    %2 = arith.cmpi ne, %1, %c0_i32_0 : i32
    scf.if %2 {
      %cst_116 = arith.constant 0.000000e+00 : f32
      %403 = vector.broadcast %cst_116 : f32 to vector<2x32xf32>
      %c0_117 = arith.constant 0 : index
      %c0_118 = arith.constant 0 : index
      %404 = vector.load %arg11[%c0_117, %c0_118] : memref<2x32xf32, #tpu.memory_space<vmem>>, vector<2x32xf32>
      tpu.vector_store %arg11[%c0_117, %c0_118], %403 {strides = array<i32>} : memref<2x32xf32, #tpu.memory_space<vmem>>, vector<2x32xf32>,
      %cst_119 = arith.constant 0.000000e+00 : f32
      %405 = vector.broadcast %cst_119 : f32 to vector<2x32xf32>
      %c0_120 = arith.constant 0 : index
      %c0_121 = arith.constant 0 : index
      %406 = vector.load %arg12[%c0_120, %c0_121] : memref<2x32xf32, #tpu.memory_space<vmem>>, vector<2x32xf32>
      tpu.vector_store %arg12[%c0_120, %c0_121], %405 {strides = array<i32>} : memref<2x32xf32, #tpu.memory_space<vmem>>, vector<2x32xf32>,
      %cst_122 = arith.constant 0.000000e+00 : f32
      %407 = vector.broadcast %cst_122 : f32 to vector<2x32xf32>
      %c0_123 = arith.constant 0 : index
      %c0_124 = arith.constant 0 : index
      %408 = vector.load %arg13[%c0_123, %c0_124] : memref<2x32xf32, #tpu.memory_space<vmem>>, vector<2x32xf32>
      tpu.vector_store %arg13[%c0_123, %c0_124], %407 {strides = array<i32>} : memref<2x32xf32, #tpu.memory_space<vmem>>, vector<2x32xf32>,
      %cst_125 = arith.constant 0.000000e+00 : f32
      %409 = vector.broadcast %cst_125 : f32 to vector<2x32xf32>
      %c0_126 = arith.constant 0 : index
      %c0_127 = arith.constant 0 : index
      %410 = vector.load %arg14[%c0_126, %c0_127] : memref<2x32xf32, #tpu.memory_space<vmem>>, vector<2x32xf32>
      tpu.vector_store %arg14[%c0_126, %c0_127], %409 {strides = array<i32>} : memref<2x32xf32, #tpu.memory_space<vmem>>, vector<2x32xf32>,
    } else {
    }
    %c0 = arith.constant 0 : index
    %c0_1 = arith.constant 0 : index
    %3 = vector.load %arg5[%c0, %c0_1] : memref<32x128xbf16, #tpu.memory_space<vmem>>, vector<32x128xbf16>
    %c0_2 = arith.constant 0 : index
    %c0_3 = arith.constant 0 : index
    %4 = vector.load %arg6[%c0_2, %c0_3] : memref<32x128xbf16, #tpu.memory_space<vmem>>, vector<32x128xbf16>
    %c0_4 = arith.constant 0 : index
    %c0_5 = arith.constant 0 : index
    %5 = vector.load %arg11[%c0_4, %c0_5] : memref<2x32xf32, #tpu.memory_space<vmem>>, vector<2x32xf32>
    %c0_6 = arith.constant 0 : index
    %c0_7 = arith.constant 0 : index
    %6 = vector.load %arg12[%c0_6, %c0_7] : memref<2x32xf32, #tpu.memory_space<vmem>>, vector<2x32xf32>
    %c0_8 = arith.constant 0 : index
    %c0_9 = arith.constant 0 : index
    %7 = vector.load %arg13[%c0_8, %c0_9] : memref<2x32xf32, #tpu.memory_space<vmem>>, vector<2x32xf32>
    %c0_10 = arith.constant 0 : index
    %c0_11 = arith.constant 0 : index
    %8 = vector.load %arg14[%c0_10, %c0_11] : memref<2x32xf32, #tpu.memory_space<vmem>>, vector<2x32xf32>
    %c0_i32_12 = arith.constant 0 : i32
    %9 = arith.index_cast %c0_i32_12 : i32 to index
    %c0_13 = arith.constant 0 : index
    %c0_14 = arith.constant 0 : index
    %10 = vector.load %arg3[%9, %c0_13, %c0_14] : memref<4x2x1xf32, #tpu.memory_space<vmem>>, vector<1x2x1xf32>
    %11 = vector.shape_cast %10 : vector<1x2x1xf32> to vector<2x1xf32>
    %12 = arith.index_cast %c0_i32_12 : i32 to index
    %c0_15 = arith.constant 0 : index
    %c0_16 = arith.constant 0 : index
    %13 = vector.load %arg1[%12, %c0_15, %c0_16] : memref<4x2x128xf32, #tpu.memory_space<vmem>>, vector<1x2x128xf32>
    %14 = vector.shape_cast %13 : vector<1x2x128xf32> to vector<2x128xf32>
    %15 = arith.truncf %5 : vector<2x32xf32> to vector<2x32xbf16>
    %cst = arith.constant dense<0.000000e+00> : vector<2x128xf32>
    %16 = tpu.matmul %15, %3, %cst {dimension_numbers = #tpu.dot_dimension_numbers<[1], [0], [0], [1], [0, 0, 1, 1], [], []>} : vector<2x32xbf16>, vector<32x128xbf16>, vector<2x128xf32> -> vector<2x128xf32>
    %17 = arith.addf %14, %16 : vector<2x128xf32>
    %18 = vector.extract_strided_slice %17 {offsets = [0, 0], sizes = [2, 32], strides = [1, 1]} : vector<2x128xf32> to vector<2x32xf32>
    %19 = arith.negf %18 : vector<2x32xf32>
    %20 = math.exp %19 : vector<2x32xf32>
    %cst_17 = arith.constant 1.000000e+00 : f32
    %21 = vector.broadcast %cst_17 : f32 to vector<2x32xf32>
    %22 = arith.addf %21, %20 : vector<2x32xf32>
    %23 = arith.divf %21, %22 : vector<2x32xf32>
    %24 = vector.extract_strided_slice %17 {offsets = [0, 32], sizes = [2, 32], strides = [1, 1]} : vector<2x128xf32> to vector<2x32xf32>
    %25 = arith.negf %24 : vector<2x32xf32>
    %26 = math.exp %25 : vector<2x32xf32>
    %cst_18 = arith.constant 1.000000e+00 : f32
    %27 = vector.broadcast %cst_18 : f32 to vector<2x32xf32>
    %28 = arith.addf %27, %26 : vector<2x32xf32>
    %29 = arith.divf %27, %28 : vector<2x32xf32>
    %30 = vector.extract_strided_slice %17 {offsets = [0, 64], sizes = [2, 32], strides = [1, 1]} : vector<2x128xf32> to vector<2x32xf32>
    %31 = math.tanh %30 : vector<2x32xf32>
    %32 = vector.extract_strided_slice %17 {offsets = [0, 96], sizes = [2, 32], strides = [1, 1]} : vector<2x128xf32> to vector<2x32xf32>
    %33 = arith.negf %32 : vector<2x32xf32>
    %34 = math.exp %33 : vector<2x32xf32>
    %cst_19 = arith.constant 1.000000e+00 : f32
    %35 = vector.broadcast %cst_19 : f32 to vector<2x32xf32>
    %36 = arith.addf %35, %34 : vector<2x32xf32>
    %37 = arith.divf %35, %36 : vector<2x32xf32>
    %38 = arith.mulf %29, %6 : vector<2x32xf32>
    %39 = arith.mulf %23, %31 : vector<2x32xf32>
    %40 = arith.addf %38, %39 : vector<2x32xf32>
    %41 = math.tanh %40 : vector<2x32xf32>
    %42 = arith.mulf %37, %41 : vector<2x32xf32>
    %cst_20 = arith.constant 0.000000e+00 : f32
    %43 = vector.broadcast %cst_20 : f32 to vector<2x1xf32>
    %44 = arith.cmpf ogt, %11, %43 : vector<2x1xf32>
    %45 = vector.shape_cast %44 : vector<2x1xi1> to vector<2x1xi1>
    %46 = vector.broadcast %45 : vector<2x1xi1> to vector<2x32xi1>
    %47 = arith.select %46, %42, %5 : vector<2x32xi1>, vector<2x32xf32>
    %48 = vector.shape_cast %44 : vector<2x1xi1> to vector<2x1xi1>
    %49 = vector.broadcast %48 : vector<2x1xi1> to vector<2x32xi1>
    %50 = arith.select %49, %40, %6 : vector<2x32xi1>, vector<2x32xf32>
    %51 = vector.broadcast %11 : vector<2x1xf32> to vector<2x32xf32>
    %52 = arith.mulf %47, %51 : vector<2x32xf32>
    %53 = arith.index_cast %c0_i32_12 : i32 to index
    %c0_21 = arith.constant 0 : index
    %c0_22 = arith.constant 0 : index
    %54 = vector.load %arg7[%53, %c0_21, %c0_22] : memref<4x2x32xf32, #tpu.memory_space<vmem>>, vector<1x2x32xf32>
    %55 = vector.shape_cast %54 : vector<1x2x32xf32> to vector<2x32xf32>
    %56 = vector.shape_cast %52 : vector<2x32xf32> to vector<1x2x32xf32>
    tpu.vector_store %arg7[%53, %c0_21, %c0_22], %56 {strides = array<i32>} : memref<4x2x32xf32, #tpu.memory_space<vmem>>, vector<1x2x32xf32>,
    %c3_i32 = arith.constant 3 : i32
    %57 = arith.subi %c3_i32, %c0_i32_12 : i32
    %58 = arith.index_cast %57 : i32 to index
    %c0_23 = arith.constant 0 : index
    %c0_24 = arith.constant 0 : index
    %59 = vector.load %arg4[%58, %c0_23, %c0_24] : memref<4x2x1xf32, #tpu.memory_space<vmem>>, vector<1x2x1xf32>
    %60 = vector.shape_cast %59 : vector<1x2x1xf32> to vector<2x1xf32>
    %61 = arith.index_cast %57 : i32 to index
    %c0_25 = arith.constant 0 : index
    %c0_26 = arith.constant 0 : index
    %62 = vector.load %arg2[%61, %c0_25, %c0_26] : memref<4x2x128xf32, #tpu.memory_space<vmem>>, vector<1x2x128xf32>
    %63 = vector.shape_cast %62 : vector<1x2x128xf32> to vector<2x128xf32>
    %64 = arith.truncf %7 : vector<2x32xf32> to vector<2x32xbf16>
    %cst_27 = arith.constant dense<0.000000e+00> : vector<2x128xf32>
    %65 = tpu.matmul %64, %4, %cst_27 {dimension_numbers = #tpu.dot_dimension_numbers<[1], [0], [0], [1], [0, 0, 1, 1], [], []>} : vector<2x32xbf16>, vector<32x128xbf16>, vector<2x128xf32> -> vector<2x128xf32>
    %66 = arith.addf %63, %65 : vector<2x128xf32>
    %67 = vector.extract_strided_slice %66 {offsets = [0, 0], sizes = [2, 32], strides = [1, 1]} : vector<2x128xf32> to vector<2x32xf32>
    %68 = arith.negf %67 : vector<2x32xf32>
    %69 = math.exp %68 : vector<2x32xf32>
    %cst_28 = arith.constant 1.000000e+00 : f32
    %70 = vector.broadcast %cst_28 : f32 to vector<2x32xf32>
    %71 = arith.addf %70, %69 : vector<2x32xf32>
    %72 = arith.divf %70, %71 : vector<2x32xf32>
    %73 = vector.extract_strided_slice %66 {offsets = [0, 32], sizes = [2, 32], strides = [1, 1]} : vector<2x128xf32> to vector<2x32xf32>
    %74 = arith.negf %73 : vector<2x32xf32>
    %75 = math.exp %74 : vector<2x32xf32>
    %cst_29 = arith.constant 1.000000e+00 : f32
    %76 = vector.broadcast %cst_29 : f32 to vector<2x32xf32>
    %77 = arith.addf %76, %75 : vector<2x32xf32>
    %78 = arith.divf %76, %77 : vector<2x32xf32>
    %79 = vector.extract_strided_slice %66 {offsets = [0, 64], sizes = [2, 32], strides = [1, 1]} : vector<2x128xf32> to vector<2x32xf32>
    %80 = math.tanh %79 : vector<2x32xf32>
    %81 = vector.extract_strided_slice %66 {offsets = [0, 96], sizes = [2, 32], strides = [1, 1]} : vector<2x128xf32> to vector<2x32xf32>
    %82 = arith.negf %81 : vector<2x32xf32>
    %83 = math.exp %82 : vector<2x32xf32>
    %cst_30 = arith.constant 1.000000e+00 : f32
    %84 = vector.broadcast %cst_30 : f32 to vector<2x32xf32>
    %85 = arith.addf %84, %83 : vector<2x32xf32>
    %86 = arith.divf %84, %85 : vector<2x32xf32>
    %87 = arith.mulf %78, %8 : vector<2x32xf32>
    %88 = arith.mulf %72, %80 : vector<2x32xf32>
    %89 = arith.addf %87, %88 : vector<2x32xf32>
    %90 = math.tanh %89 : vector<2x32xf32>
    %91 = arith.mulf %86, %90 : vector<2x32xf32>
    %cst_31 = arith.constant 0.000000e+00 : f32
    %92 = vector.broadcast %cst_31 : f32 to vector<2x1xf32>
    %93 = arith.cmpf ogt, %60, %92 : vector<2x1xf32>
    %94 = vector.shape_cast %93 : vector<2x1xi1> to vector<2x1xi1>
    %95 = vector.broadcast %94 : vector<2x1xi1> to vector<2x32xi1>
    %96 = arith.select %95, %91, %7 : vector<2x32xi1>, vector<2x32xf32>
    %97 = vector.shape_cast %93 : vector<2x1xi1> to vector<2x1xi1>
    %98 = vector.broadcast %97 : vector<2x1xi1> to vector<2x32xi1>
    %99 = arith.select %98, %89, %8 : vector<2x32xi1>, vector<2x32xf32>
    %100 = vector.broadcast %60 : vector<2x1xf32> to vector<2x32xf32>
    %101 = arith.mulf %96, %100 : vector<2x32xf32>
    %102 = arith.index_cast %57 : i32 to index
    %c0_32 = arith.constant 0 : index
    %c0_33 = arith.constant 0 : index
    %103 = vector.load %arg8[%102, %c0_32, %c0_33] : memref<4x2x32xf32, #tpu.memory_space<vmem>>, vector<1x2x32xf32>
    %104 = vector.shape_cast %103 : vector<1x2x32xf32> to vector<2x32xf32>
    %105 = vector.shape_cast %101 : vector<2x32xf32> to vector<1x2x32xf32>
    tpu.vector_store %arg8[%102, %c0_32, %c0_33], %105 {strides = array<i32>} : memref<4x2x32xf32, #tpu.memory_space<vmem>>, vector<1x2x32xf32>,
    %c1_i32 = arith.constant 1 : i32
    %106 = arith.index_cast %c1_i32 : i32 to index
    %c0_34 = arith.constant 0 : index
    %c0_35 = arith.constant 0 : index
    %107 = vector.load %arg3[%106, %c0_34, %c0_35] : memref<4x2x1xf32, #tpu.memory_space<vmem>>, vector<1x2x1xf32>
    %108 = vector.shape_cast %107 : vector<1x2x1xf32> to vector<2x1xf32>
    %109 = arith.index_cast %c1_i32 : i32 to index
    %c0_36 = arith.constant 0 : index
    %c0_37 = arith.constant 0 : index
    %110 = vector.load %arg1[%109, %c0_36, %c0_37] : memref<4x2x128xf32, #tpu.memory_space<vmem>>, vector<1x2x128xf32>
    %111 = vector.shape_cast %110 : vector<1x2x128xf32> to vector<2x128xf32>
    %112 = arith.truncf %47 : vector<2x32xf32> to vector<2x32xbf16>
    %cst_38 = arith.constant dense<0.000000e+00> : vector<2x128xf32>
    %113 = tpu.matmul %112, %3, %cst_38 {dimension_numbers = #tpu.dot_dimension_numbers<[1], [0], [0], [1], [0, 0, 1, 1], [], []>} : vector<2x32xbf16>, vector<32x128xbf16>, vector<2x128xf32> -> vector<2x128xf32>
    %114 = arith.addf %111, %113 : vector<2x128xf32>
    %115 = vector.extract_strided_slice %114 {offsets = [0, 0], sizes = [2, 32], strides = [1, 1]} : vector<2x128xf32> to vector<2x32xf32>
    %116 = arith.negf %115 : vector<2x32xf32>
    %117 = math.exp %116 : vector<2x32xf32>
    %cst_39 = arith.constant 1.000000e+00 : f32
    %118 = vector.broadcast %cst_39 : f32 to vector<2x32xf32>
    %119 = arith.addf %118, %117 : vector<2x32xf32>
    %120 = arith.divf %118, %119 : vector<2x32xf32>
    %121 = vector.extract_strided_slice %114 {offsets = [0, 32], sizes = [2, 32], strides = [1, 1]} : vector<2x128xf32> to vector<2x32xf32>
    %122 = arith.negf %121 : vector<2x32xf32>
    %123 = math.exp %122 : vector<2x32xf32>
    %cst_40 = arith.constant 1.000000e+00 : f32
    %124 = vector.broadcast %cst_40 : f32 to vector<2x32xf32>
    %125 = arith.addf %124, %123 : vector<2x32xf32>
    %126 = arith.divf %124, %125 : vector<2x32xf32>
    %127 = vector.extract_strided_slice %114 {offsets = [0, 64], sizes = [2, 32], strides = [1, 1]} : vector<2x128xf32> to vector<2x32xf32>
    %128 = math.tanh %127 : vector<2x32xf32>
    %129 = vector.extract_strided_slice %114 {offsets = [0, 96], sizes = [2, 32], strides = [1, 1]} : vector<2x128xf32> to vector<2x32xf32>
    %130 = arith.negf %129 : vector<2x32xf32>
    %131 = math.exp %130 : vector<2x32xf32>
    %cst_41 = arith.constant 1.000000e+00 : f32
    %132 = vector.broadcast %cst_41 : f32 to vector<2x32xf32>
    %133 = arith.addf %132, %131 : vector<2x32xf32>
    %134 = arith.divf %132, %133 : vector<2x32xf32>
    %135 = arith.mulf %126, %50 : vector<2x32xf32>
    %136 = arith.mulf %120, %128 : vector<2x32xf32>
    %137 = arith.addf %135, %136 : vector<2x32xf32>
    %138 = math.tanh %137 : vector<2x32xf32>
    %139 = arith.mulf %134, %138 : vector<2x32xf32>
    %cst_42 = arith.constant 0.000000e+00 : f32
    %140 = vector.broadcast %cst_42 : f32 to vector<2x1xf32>
    %141 = arith.cmpf ogt, %108, %140 : vector<2x1xf32>
    %142 = vector.shape_cast %141 : vector<2x1xi1> to vector<2x1xi1>
    %143 = vector.broadcast %142 : vector<2x1xi1> to vector<2x32xi1>
    %144 = arith.select %143, %139, %47 : vector<2x32xi1>, vector<2x32xf32>
    %145 = vector.shape_cast %141 : vector<2x1xi1> to vector<2x1xi1>
    %146 = vector.broadcast %145 : vector<2x1xi1> to vector<2x32xi1>
    %147 = arith.select %146, %137, %50 : vector<2x32xi1>, vector<2x32xf32>
    %148 = vector.broadcast %108 : vector<2x1xf32> to vector<2x32xf32>
    %149 = arith.mulf %144, %148 : vector<2x32xf32>
    %150 = arith.index_cast %c1_i32 : i32 to index
    %c0_43 = arith.constant 0 : index
    %c0_44 = arith.constant 0 : index
    %151 = vector.load %arg7[%150, %c0_43, %c0_44] : memref<4x2x32xf32, #tpu.memory_space<vmem>>, vector<1x2x32xf32>
    %152 = vector.shape_cast %151 : vector<1x2x32xf32> to vector<2x32xf32>
    %153 = vector.shape_cast %149 : vector<2x32xf32> to vector<1x2x32xf32>
    tpu.vector_store %arg7[%150, %c0_43, %c0_44], %153 {strides = array<i32>} : memref<4x2x32xf32, #tpu.memory_space<vmem>>, vector<1x2x32xf32>,
    %c3_i32_45 = arith.constant 3 : i32
    %154 = arith.subi %c3_i32_45, %c1_i32 : i32
    %155 = arith.index_cast %154 : i32 to index
    %c0_46 = arith.constant 0 : index
    %c0_47 = arith.constant 0 : index
    %156 = vector.load %arg4[%155, %c0_46, %c0_47] : memref<4x2x1xf32, #tpu.memory_space<vmem>>, vector<1x2x1xf32>
    %157 = vector.shape_cast %156 : vector<1x2x1xf32> to vector<2x1xf32>
    %158 = arith.index_cast %154 : i32 to index
    %c0_48 = arith.constant 0 : index
    %c0_49 = arith.constant 0 : index
    %159 = vector.load %arg2[%158, %c0_48, %c0_49] : memref<4x2x128xf32, #tpu.memory_space<vmem>>, vector<1x2x128xf32>
    %160 = vector.shape_cast %159 : vector<1x2x128xf32> to vector<2x128xf32>
    %161 = arith.truncf %96 : vector<2x32xf32> to vector<2x32xbf16>
    %cst_50 = arith.constant dense<0.000000e+00> : vector<2x128xf32>
    %162 = tpu.matmul %161, %4, %cst_50 {dimension_numbers = #tpu.dot_dimension_numbers<[1], [0], [0], [1], [0, 0, 1, 1], [], []>} : vector<2x32xbf16>, vector<32x128xbf16>, vector<2x128xf32> -> vector<2x128xf32>
    %163 = arith.addf %160, %162 : vector<2x128xf32>
    %164 = vector.extract_strided_slice %163 {offsets = [0, 0], sizes = [2, 32], strides = [1, 1]} : vector<2x128xf32> to vector<2x32xf32>
    %165 = arith.negf %164 : vector<2x32xf32>
    %166 = math.exp %165 : vector<2x32xf32>
    %cst_51 = arith.constant 1.000000e+00 : f32
    %167 = vector.broadcast %cst_51 : f32 to vector<2x32xf32>
    %168 = arith.addf %167, %166 : vector<2x32xf32>
    %169 = arith.divf %167, %168 : vector<2x32xf32>
    %170 = vector.extract_strided_slice %163 {offsets = [0, 32], sizes = [2, 32], strides = [1, 1]} : vector<2x128xf32> to vector<2x32xf32>
    %171 = arith.negf %170 : vector<2x32xf32>
    %172 = math.exp %171 : vector<2x32xf32>
    %cst_52 = arith.constant 1.000000e+00 : f32
    %173 = vector.broadcast %cst_52 : f32 to vector<2x32xf32>
    %174 = arith.addf %173, %172 : vector<2x32xf32>
    %175 = arith.divf %173, %174 : vector<2x32xf32>
    %176 = vector.extract_strided_slice %163 {offsets = [0, 64], sizes = [2, 32], strides = [1, 1]} : vector<2x128xf32> to vector<2x32xf32>
    %177 = math.tanh %176 : vector<2x32xf32>
    %178 = vector.extract_strided_slice %163 {offsets = [0, 96], sizes = [2, 32], strides = [1, 1]} : vector<2x128xf32> to vector<2x32xf32>
    %179 = arith.negf %178 : vector<2x32xf32>
    %180 = math.exp %179 : vector<2x32xf32>
    %cst_53 = arith.constant 1.000000e+00 : f32
    %181 = vector.broadcast %cst_53 : f32 to vector<2x32xf32>
    %182 = arith.addf %181, %180 : vector<2x32xf32>
    %183 = arith.divf %181, %182 : vector<2x32xf32>
    %184 = arith.mulf %175, %99 : vector<2x32xf32>
    %185 = arith.mulf %169, %177 : vector<2x32xf32>
    %186 = arith.addf %184, %185 : vector<2x32xf32>
    %187 = math.tanh %186 : vector<2x32xf32>
    %188 = arith.mulf %183, %187 : vector<2x32xf32>
    %cst_54 = arith.constant 0.000000e+00 : f32
    %189 = vector.broadcast %cst_54 : f32 to vector<2x1xf32>
    %190 = arith.cmpf ogt, %157, %189 : vector<2x1xf32>
    %191 = vector.shape_cast %190 : vector<2x1xi1> to vector<2x1xi1>
    %192 = vector.broadcast %191 : vector<2x1xi1> to vector<2x32xi1>
    %193 = arith.select %192, %188, %96 : vector<2x32xi1>, vector<2x32xf32>
    %194 = vector.shape_cast %190 : vector<2x1xi1> to vector<2x1xi1>
    %195 = vector.broadcast %194 : vector<2x1xi1> to vector<2x32xi1>
    %196 = arith.select %195, %186, %99 : vector<2x32xi1>, vector<2x32xf32>
    %197 = vector.broadcast %157 : vector<2x1xf32> to vector<2x32xf32>
    %198 = arith.mulf %193, %197 : vector<2x32xf32>
    %199 = arith.index_cast %154 : i32 to index
    %c0_55 = arith.constant 0 : index
    %c0_56 = arith.constant 0 : index
    %200 = vector.load %arg8[%199, %c0_55, %c0_56] : memref<4x2x32xf32, #tpu.memory_space<vmem>>, vector<1x2x32xf32>
    %201 = vector.shape_cast %200 : vector<1x2x32xf32> to vector<2x32xf32>
    %202 = vector.shape_cast %198 : vector<2x32xf32> to vector<1x2x32xf32>
    tpu.vector_store %arg8[%199, %c0_55, %c0_56], %202 {strides = array<i32>} : memref<4x2x32xf32, #tpu.memory_space<vmem>>, vector<1x2x32xf32>,
    %c2_i32 = arith.constant 2 : i32
    %203 = arith.index_cast %c2_i32 : i32 to index
    %c0_57 = arith.constant 0 : index
    %c0_58 = arith.constant 0 : index
    %204 = vector.load %arg3[%203, %c0_57, %c0_58] : memref<4x2x1xf32, #tpu.memory_space<vmem>>, vector<1x2x1xf32>
    %205 = vector.shape_cast %204 : vector<1x2x1xf32> to vector<2x1xf32>
    %206 = arith.index_cast %c2_i32 : i32 to index
    %c0_59 = arith.constant 0 : index
    %c0_60 = arith.constant 0 : index
    %207 = vector.load %arg1[%206, %c0_59, %c0_60] : memref<4x2x128xf32, #tpu.memory_space<vmem>>, vector<1x2x128xf32>
    %208 = vector.shape_cast %207 : vector<1x2x128xf32> to vector<2x128xf32>
    %209 = arith.truncf %144 : vector<2x32xf32> to vector<2x32xbf16>
    %cst_61 = arith.constant dense<0.000000e+00> : vector<2x128xf32>
    %210 = tpu.matmul %209, %3, %cst_61 {dimension_numbers = #tpu.dot_dimension_numbers<[1], [0], [0], [1], [0, 0, 1, 1], [], []>} : vector<2x32xbf16>, vector<32x128xbf16>, vector<2x128xf32> -> vector<2x128xf32>
    %211 = arith.addf %208, %210 : vector<2x128xf32>
    %212 = vector.extract_strided_slice %211 {offsets = [0, 0], sizes = [2, 32], strides = [1, 1]} : vector<2x128xf32> to vector<2x32xf32>
    %213 = arith.negf %212 : vector<2x32xf32>
    %214 = math.exp %213 : vector<2x32xf32>
    %cst_62 = arith.constant 1.000000e+00 : f32
    %215 = vector.broadcast %cst_62 : f32 to vector<2x32xf32>
    %216 = arith.addf %215, %214 : vector<2x32xf32>
    %217 = arith.divf %215, %216 : vector<2x32xf32>
    %218 = vector.extract_strided_slice %211 {offsets = [0, 32], sizes = [2, 32], strides = [1, 1]} : vector<2x128xf32> to vector<2x32xf32>
    %219 = arith.negf %218 : vector<2x32xf32>
    %220 = math.exp %219 : vector<2x32xf32>
    %cst_63 = arith.constant 1.000000e+00 : f32
    %221 = vector.broadcast %cst_63 : f32 to vector<2x32xf32>
    %222 = arith.addf %221, %220 : vector<2x32xf32>
    %223 = arith.divf %221, %222 : vector<2x32xf32>
    %224 = vector.extract_strided_slice %211 {offsets = [0, 64], sizes = [2, 32], strides = [1, 1]} : vector<2x128xf32> to vector<2x32xf32>
    %225 = math.tanh %224 : vector<2x32xf32>
    %226 = vector.extract_strided_slice %211 {offsets = [0, 96], sizes = [2, 32], strides = [1, 1]} : vector<2x128xf32> to vector<2x32xf32>
    %227 = arith.negf %226 : vector<2x32xf32>
    %228 = math.exp %227 : vector<2x32xf32>
    %cst_64 = arith.constant 1.000000e+00 : f32
    %229 = vector.broadcast %cst_64 : f32 to vector<2x32xf32>
    %230 = arith.addf %229, %228 : vector<2x32xf32>
    %231 = arith.divf %229, %230 : vector<2x32xf32>
    %232 = arith.mulf %223, %147 : vector<2x32xf32>
    %233 = arith.mulf %217, %225 : vector<2x32xf32>
    %234 = arith.addf %232, %233 : vector<2x32xf32>
    %235 = math.tanh %234 : vector<2x32xf32>
    %236 = arith.mulf %231, %235 : vector<2x32xf32>
    %cst_65 = arith.constant 0.000000e+00 : f32
    %237 = vector.broadcast %cst_65 : f32 to vector<2x1xf32>
    %238 = arith.cmpf ogt, %205, %237 : vector<2x1xf32>
    %239 = vector.shape_cast %238 : vector<2x1xi1> to vector<2x1xi1>
    %240 = vector.broadcast %239 : vector<2x1xi1> to vector<2x32xi1>
    %241 = arith.select %240, %236, %144 : vector<2x32xi1>, vector<2x32xf32>
    %242 = vector.shape_cast %238 : vector<2x1xi1> to vector<2x1xi1>
    %243 = vector.broadcast %242 : vector<2x1xi1> to vector<2x32xi1>
    %244 = arith.select %243, %234, %147 : vector<2x32xi1>, vector<2x32xf32>
    %245 = vector.broadcast %205 : vector<2x1xf32> to vector<2x32xf32>
    %246 = arith.mulf %241, %245 : vector<2x32xf32>
    %247 = arith.index_cast %c2_i32 : i32 to index
    %c0_66 = arith.constant 0 : index
    %c0_67 = arith.constant 0 : index
    %248 = vector.load %arg7[%247, %c0_66, %c0_67] : memref<4x2x32xf32, #tpu.memory_space<vmem>>, vector<1x2x32xf32>
    %249 = vector.shape_cast %248 : vector<1x2x32xf32> to vector<2x32xf32>
    %250 = vector.shape_cast %246 : vector<2x32xf32> to vector<1x2x32xf32>
    tpu.vector_store %arg7[%247, %c0_66, %c0_67], %250 {strides = array<i32>} : memref<4x2x32xf32, #tpu.memory_space<vmem>>, vector<1x2x32xf32>,
    %c3_i32_68 = arith.constant 3 : i32
    %251 = arith.subi %c3_i32_68, %c2_i32 : i32
    %252 = arith.index_cast %251 : i32 to index
    %c0_69 = arith.constant 0 : index
    %c0_70 = arith.constant 0 : index
    %253 = vector.load %arg4[%252, %c0_69, %c0_70] : memref<4x2x1xf32, #tpu.memory_space<vmem>>, vector<1x2x1xf32>
    %254 = vector.shape_cast %253 : vector<1x2x1xf32> to vector<2x1xf32>
    %255 = arith.index_cast %251 : i32 to index
    %c0_71 = arith.constant 0 : index
    %c0_72 = arith.constant 0 : index
    %256 = vector.load %arg2[%255, %c0_71, %c0_72] : memref<4x2x128xf32, #tpu.memory_space<vmem>>, vector<1x2x128xf32>
    %257 = vector.shape_cast %256 : vector<1x2x128xf32> to vector<2x128xf32>
    %258 = arith.truncf %193 : vector<2x32xf32> to vector<2x32xbf16>
    %cst_73 = arith.constant dense<0.000000e+00> : vector<2x128xf32>
    %259 = tpu.matmul %258, %4, %cst_73 {dimension_numbers = #tpu.dot_dimension_numbers<[1], [0], [0], [1], [0, 0, 1, 1], [], []>} : vector<2x32xbf16>, vector<32x128xbf16>, vector<2x128xf32> -> vector<2x128xf32>
    %260 = arith.addf %257, %259 : vector<2x128xf32>
    %261 = vector.extract_strided_slice %260 {offsets = [0, 0], sizes = [2, 32], strides = [1, 1]} : vector<2x128xf32> to vector<2x32xf32>
    %262 = arith.negf %261 : vector<2x32xf32>
    %263 = math.exp %262 : vector<2x32xf32>
    %cst_74 = arith.constant 1.000000e+00 : f32
    %264 = vector.broadcast %cst_74 : f32 to vector<2x32xf32>
    %265 = arith.addf %264, %263 : vector<2x32xf32>
    %266 = arith.divf %264, %265 : vector<2x32xf32>
    %267 = vector.extract_strided_slice %260 {offsets = [0, 32], sizes = [2, 32], strides = [1, 1]} : vector<2x128xf32> to vector<2x32xf32>
    %268 = arith.negf %267 : vector<2x32xf32>
    %269 = math.exp %268 : vector<2x32xf32>
    %cst_75 = arith.constant 1.000000e+00 : f32
    %270 = vector.broadcast %cst_75 : f32 to vector<2x32xf32>
    %271 = arith.addf %270, %269 : vector<2x32xf32>
    %272 = arith.divf %270, %271 : vector<2x32xf32>
    %273 = vector.extract_strided_slice %260 {offsets = [0, 64], sizes = [2, 32], strides = [1, 1]} : vector<2x128xf32> to vector<2x32xf32>
    %274 = math.tanh %273 : vector<2x32xf32>
    %275 = vector.extract_strided_slice %260 {offsets = [0, 96], sizes = [2, 32], strides = [1, 1]} : vector<2x128xf32> to vector<2x32xf32>
    %276 = arith.negf %275 : vector<2x32xf32>
    %277 = math.exp %276 : vector<2x32xf32>
    %cst_76 = arith.constant 1.000000e+00 : f32
    %278 = vector.broadcast %cst_76 : f32 to vector<2x32xf32>
    %279 = arith.addf %278, %277 : vector<2x32xf32>
    %280 = arith.divf %278, %279 : vector<2x32xf32>
    %281 = arith.mulf %272, %196 : vector<2x32xf32>
    %282 = arith.mulf %266, %274 : vector<2x32xf32>
    %283 = arith.addf %281, %282 : vector<2x32xf32>
    %284 = math.tanh %283 : vector<2x32xf32>
    %285 = arith.mulf %280, %284 : vector<2x32xf32>
    %cst_77 = arith.constant 0.000000e+00 : f32
    %286 = vector.broadcast %cst_77 : f32 to vector<2x1xf32>
    %287 = arith.cmpf ogt, %254, %286 : vector<2x1xf32>
    %288 = vector.shape_cast %287 : vector<2x1xi1> to vector<2x1xi1>
    %289 = vector.broadcast %288 : vector<2x1xi1> to vector<2x32xi1>
    %290 = arith.select %289, %285, %193 : vector<2x32xi1>, vector<2x32xf32>
    %291 = vector.shape_cast %287 : vector<2x1xi1> to vector<2x1xi1>
    %292 = vector.broadcast %291 : vector<2x1xi1> to vector<2x32xi1>
    %293 = arith.select %292, %283, %196 : vector<2x32xi1>, vector<2x32xf32>
    %294 = vector.broadcast %254 : vector<2x1xf32> to vector<2x32xf32>
    %295 = arith.mulf %290, %294 : vector<2x32xf32>
    %296 = arith.index_cast %251 : i32 to index
    %c0_78 = arith.constant 0 : index
    %c0_79 = arith.constant 0 : index
    %297 = vector.load %arg8[%296, %c0_78, %c0_79] : memref<4x2x32xf32, #tpu.memory_space<vmem>>, vector<1x2x32xf32>
    %298 = vector.shape_cast %297 : vector<1x2x32xf32> to vector<2x32xf32>
    %299 = vector.shape_cast %295 : vector<2x32xf32> to vector<1x2x32xf32>
    tpu.vector_store %arg8[%296, %c0_78, %c0_79], %299 {strides = array<i32>} : memref<4x2x32xf32, #tpu.memory_space<vmem>>, vector<1x2x32xf32>,
    %c3_i32_80 = arith.constant 3 : i32
    %300 = arith.index_cast %c3_i32_80 : i32 to index
    %c0_81 = arith.constant 0 : index
    %c0_82 = arith.constant 0 : index
    %301 = vector.load %arg3[%300, %c0_81, %c0_82] : memref<4x2x1xf32, #tpu.memory_space<vmem>>, vector<1x2x1xf32>
    %302 = vector.shape_cast %301 : vector<1x2x1xf32> to vector<2x1xf32>
    %303 = arith.index_cast %c3_i32_80 : i32 to index
    %c0_83 = arith.constant 0 : index
    %c0_84 = arith.constant 0 : index
    %304 = vector.load %arg1[%303, %c0_83, %c0_84] : memref<4x2x128xf32, #tpu.memory_space<vmem>>, vector<1x2x128xf32>
    %305 = vector.shape_cast %304 : vector<1x2x128xf32> to vector<2x128xf32>
    %306 = arith.truncf %241 : vector<2x32xf32> to vector<2x32xbf16>
    %cst_85 = arith.constant dense<0.000000e+00> : vector<2x128xf32>
    %307 = tpu.matmul %306, %3, %cst_85 {dimension_numbers = #tpu.dot_dimension_numbers<[1], [0], [0], [1], [0, 0, 1, 1], [], []>} : vector<2x32xbf16>, vector<32x128xbf16>, vector<2x128xf32> -> vector<2x128xf32>
    %308 = arith.addf %305, %307 : vector<2x128xf32>
    %309 = vector.extract_strided_slice %308 {offsets = [0, 0], sizes = [2, 32], strides = [1, 1]} : vector<2x128xf32> to vector<2x32xf32>
    %310 = arith.negf %309 : vector<2x32xf32>
    %311 = math.exp %310 : vector<2x32xf32>
    %cst_86 = arith.constant 1.000000e+00 : f32
    %312 = vector.broadcast %cst_86 : f32 to vector<2x32xf32>
    %313 = arith.addf %312, %311 : vector<2x32xf32>
    %314 = arith.divf %312, %313 : vector<2x32xf32>
    %315 = vector.extract_strided_slice %308 {offsets = [0, 32], sizes = [2, 32], strides = [1, 1]} : vector<2x128xf32> to vector<2x32xf32>
    %316 = arith.negf %315 : vector<2x32xf32>
    %317 = math.exp %316 : vector<2x32xf32>
    %cst_87 = arith.constant 1.000000e+00 : f32
    %318 = vector.broadcast %cst_87 : f32 to vector<2x32xf32>
    %319 = arith.addf %318, %317 : vector<2x32xf32>
    %320 = arith.divf %318, %319 : vector<2x32xf32>
    %321 = vector.extract_strided_slice %308 {offsets = [0, 64], sizes = [2, 32], strides = [1, 1]} : vector<2x128xf32> to vector<2x32xf32>
    %322 = math.tanh %321 : vector<2x32xf32>
    %323 = vector.extract_strided_slice %308 {offsets = [0, 96], sizes = [2, 32], strides = [1, 1]} : vector<2x128xf32> to vector<2x32xf32>
    %324 = arith.negf %323 : vector<2x32xf32>
    %325 = math.exp %324 : vector<2x32xf32>
    %cst_88 = arith.constant 1.000000e+00 : f32
    %326 = vector.broadcast %cst_88 : f32 to vector<2x32xf32>
    %327 = arith.addf %326, %325 : vector<2x32xf32>
    %328 = arith.divf %326, %327 : vector<2x32xf32>
    %329 = arith.mulf %320, %244 : vector<2x32xf32>
    %330 = arith.mulf %314, %322 : vector<2x32xf32>
    %331 = arith.addf %329, %330 : vector<2x32xf32>
    %332 = math.tanh %331 : vector<2x32xf32>
    %333 = arith.mulf %328, %332 : vector<2x32xf32>
    %cst_89 = arith.constant 0.000000e+00 : f32
    %334 = vector.broadcast %cst_89 : f32 to vector<2x1xf32>
    %335 = arith.cmpf ogt, %302, %334 : vector<2x1xf32>
    %336 = vector.shape_cast %335 : vector<2x1xi1> to vector<2x1xi1>
    %337 = vector.broadcast %336 : vector<2x1xi1> to vector<2x32xi1>
    %338 = arith.select %337, %333, %241 : vector<2x32xi1>, vector<2x32xf32>
    %339 = vector.shape_cast %335 : vector<2x1xi1> to vector<2x1xi1>
    %340 = vector.broadcast %339 : vector<2x1xi1> to vector<2x32xi1>
    %341 = arith.select %340, %331, %244 : vector<2x32xi1>, vector<2x32xf32>
    %342 = vector.broadcast %302 : vector<2x1xf32> to vector<2x32xf32>
    %343 = arith.mulf %338, %342 : vector<2x32xf32>
    %344 = arith.index_cast %c3_i32_80 : i32 to index
    %c0_90 = arith.constant 0 : index
    %c0_91 = arith.constant 0 : index
    %345 = vector.load %arg7[%344, %c0_90, %c0_91] : memref<4x2x32xf32, #tpu.memory_space<vmem>>, vector<1x2x32xf32>
    %346 = vector.shape_cast %345 : vector<1x2x32xf32> to vector<2x32xf32>
    %347 = vector.shape_cast %343 : vector<2x32xf32> to vector<1x2x32xf32>
    tpu.vector_store %arg7[%344, %c0_90, %c0_91], %347 {strides = array<i32>} : memref<4x2x32xf32, #tpu.memory_space<vmem>>, vector<1x2x32xf32>,
    %c3_i32_92 = arith.constant 3 : i32
    %348 = arith.subi %c3_i32_92, %c3_i32_80 : i32
    %349 = arith.index_cast %348 : i32 to index
    %c0_93 = arith.constant 0 : index
    %c0_94 = arith.constant 0 : index
    %350 = vector.load %arg4[%349, %c0_93, %c0_94] : memref<4x2x1xf32, #tpu.memory_space<vmem>>, vector<1x2x1xf32>
    %351 = vector.shape_cast %350 : vector<1x2x1xf32> to vector<2x1xf32>
    %352 = arith.index_cast %348 : i32 to index
    %c0_95 = arith.constant 0 : index
    %c0_96 = arith.constant 0 : index
    %353 = vector.load %arg2[%352, %c0_95, %c0_96] : memref<4x2x128xf32, #tpu.memory_space<vmem>>, vector<1x2x128xf32>
    %354 = vector.shape_cast %353 : vector<1x2x128xf32> to vector<2x128xf32>
    %355 = arith.truncf %290 : vector<2x32xf32> to vector<2x32xbf16>
    %cst_97 = arith.constant dense<0.000000e+00> : vector<2x128xf32>
    %356 = tpu.matmul %355, %4, %cst_97 {dimension_numbers = #tpu.dot_dimension_numbers<[1], [0], [0], [1], [0, 0, 1, 1], [], []>} : vector<2x32xbf16>, vector<32x128xbf16>, vector<2x128xf32> -> vector<2x128xf32>
    %357 = arith.addf %354, %356 : vector<2x128xf32>
    %358 = vector.extract_strided_slice %357 {offsets = [0, 0], sizes = [2, 32], strides = [1, 1]} : vector<2x128xf32> to vector<2x32xf32>
    %359 = arith.negf %358 : vector<2x32xf32>
    %360 = math.exp %359 : vector<2x32xf32>
    %cst_98 = arith.constant 1.000000e+00 : f32
    %361 = vector.broadcast %cst_98 : f32 to vector<2x32xf32>
    %362 = arith.addf %361, %360 : vector<2x32xf32>
    %363 = arith.divf %361, %362 : vector<2x32xf32>
    %364 = vector.extract_strided_slice %357 {offsets = [0, 32], sizes = [2, 32], strides = [1, 1]} : vector<2x128xf32> to vector<2x32xf32>
    %365 = arith.negf %364 : vector<2x32xf32>
    %366 = math.exp %365 : vector<2x32xf32>
    %cst_99 = arith.constant 1.000000e+00 : f32
    %367 = vector.broadcast %cst_99 : f32 to vector<2x32xf32>
    %368 = arith.addf %367, %366 : vector<2x32xf32>
    %369 = arith.divf %367, %368 : vector<2x32xf32>
    %370 = vector.extract_strided_slice %357 {offsets = [0, 64], sizes = [2, 32], strides = [1, 1]} : vector<2x128xf32> to vector<2x32xf32>
    %371 = math.tanh %370 : vector<2x32xf32>
    %372 = vector.extract_strided_slice %357 {offsets = [0, 96], sizes = [2, 32], strides = [1, 1]} : vector<2x128xf32> to vector<2x32xf32>
    %373 = arith.negf %372 : vector<2x32xf32>
    %374 = math.exp %373 : vector<2x32xf32>
    %cst_100 = arith.constant 1.000000e+00 : f32
    %375 = vector.broadcast %cst_100 : f32 to vector<2x32xf32>
    %376 = arith.addf %375, %374 : vector<2x32xf32>
    %377 = arith.divf %375, %376 : vector<2x32xf32>
    %378 = arith.mulf %369, %293 : vector<2x32xf32>
    %379 = arith.mulf %363, %371 : vector<2x32xf32>
    %380 = arith.addf %378, %379 : vector<2x32xf32>
    %381 = math.tanh %380 : vector<2x32xf32>
    %382 = arith.mulf %377, %381 : vector<2x32xf32>
    %cst_101 = arith.constant 0.000000e+00 : f32
    %383 = vector.broadcast %cst_101 : f32 to vector<2x1xf32>
    %384 = arith.cmpf ogt, %351, %383 : vector<2x1xf32>
    %385 = vector.shape_cast %384 : vector<2x1xi1> to vector<2x1xi1>
    %386 = vector.broadcast %385 : vector<2x1xi1> to vector<2x32xi1>
    %387 = arith.select %386, %382, %290 : vector<2x32xi1>, vector<2x32xf32>
    %388 = vector.shape_cast %384 : vector<2x1xi1> to vector<2x1xi1>
    %389 = vector.broadcast %388 : vector<2x1xi1> to vector<2x32xi1>
    %390 = arith.select %389, %380, %293 : vector<2x32xi1>, vector<2x32xf32>
    %391 = vector.broadcast %351 : vector<2x1xf32> to vector<2x32xf32>
    %392 = arith.mulf %387, %391 : vector<2x32xf32>
    %393 = arith.index_cast %348 : i32 to index
    %c0_102 = arith.constant 0 : index
    %c0_103 = arith.constant 0 : index
    %394 = vector.load %arg8[%393, %c0_102, %c0_103] : memref<4x2x32xf32, #tpu.memory_space<vmem>>, vector<1x2x32xf32>
    %395 = vector.shape_cast %394 : vector<1x2x32xf32> to vector<2x32xf32>
    %396 = vector.shape_cast %392 : vector<2x32xf32> to vector<1x2x32xf32>
    tpu.vector_store %arg8[%393, %c0_102, %c0_103], %396 {strides = array<i32>} : memref<4x2x32xf32, #tpu.memory_space<vmem>>, vector<1x2x32xf32>,
    %c4_i32 = arith.constant 4 : i32
    %c0_104 = arith.constant 0 : index
    %c0_105 = arith.constant 0 : index
    %397 = vector.load %arg11[%c0_104, %c0_105] : memref<2x32xf32, #tpu.memory_space<vmem>>, vector<2x32xf32>
    tpu.vector_store %arg11[%c0_104, %c0_105], %338 {strides = array<i32>} : memref<2x32xf32, #tpu.memory_space<vmem>>, vector<2x32xf32>,
    %c0_106 = arith.constant 0 : index
    %c0_107 = arith.constant 0 : index
    %398 = vector.load %arg12[%c0_106, %c0_107] : memref<2x32xf32, #tpu.memory_space<vmem>>, vector<2x32xf32>
    tpu.vector_store %arg12[%c0_106, %c0_107], %341 {strides = array<i32>} : memref<2x32xf32, #tpu.memory_space<vmem>>, vector<2x32xf32>,
    %c0_108 = arith.constant 0 : index
    %c0_109 = arith.constant 0 : index
    %399 = vector.load %arg13[%c0_108, %c0_109] : memref<2x32xf32, #tpu.memory_space<vmem>>, vector<2x32xf32>
    tpu.vector_store %arg13[%c0_108, %c0_109], %387 {strides = array<i32>} : memref<2x32xf32, #tpu.memory_space<vmem>>, vector<2x32xf32>,
    %c0_110 = arith.constant 0 : index
    %c0_111 = arith.constant 0 : index
    %400 = vector.load %arg14[%c0_110, %c0_111] : memref<2x32xf32, #tpu.memory_space<vmem>>, vector<2x32xf32>
    tpu.vector_store %arg14[%c0_110, %c0_111], %390 {strides = array<i32>} : memref<2x32xf32, #tpu.memory_space<vmem>>, vector<2x32xf32>,
    %c0_112 = arith.constant 0 : index
    %c0_113 = arith.constant 0 : index
    %401 = vector.load %arg9[%c0_112, %c0_113] : memref<2x32xf32, #tpu.memory_space<vmem>>, vector<2x32xf32>
    tpu.vector_store %arg9[%c0_112, %c0_113], %341 {strides = array<i32>} : memref<2x32xf32, #tpu.memory_space<vmem>>, vector<2x32xf32>,
    %c0_114 = arith.constant 0 : index
    %c0_115 = arith.constant 0 : index
    %402 = vector.load %arg10[%c0_114, %c0_115] : memref<2x32xf32, #tpu.memory_space<vmem>>, vector<2x32xf32>
    tpu.vector_store %arg10[%c0_114, %c0_115], %390 {strides = array<i32>} : memref<2x32xf32, #tpu.memory_space<vmem>>, vector<2x32xf32>,
    return
  }
  func.func @transform_0(%arg0: i32) -> (i32, i32, i32) {
    %c0_i32 = arith.constant 0 : i32
    %c0_i32_0 = arith.constant 0 : i32
    %c0_i32_1 = arith.constant 0 : i32
    return %arg0, %c0_i32, %c0_i32_0 : i32, i32, i32
  }
  func.func @transform_1(%arg0: i32) -> (i32, i32, i32) {
    %c1_i32 = arith.constant 1 : i32
    %0 = arith.subi %c1_i32, %arg0 : i32
    %c0_i32 = arith.constant 0 : i32
    %c0_i32_0 = arith.constant 0 : i32
    %c0_i32_1 = arith.constant 0 : i32
    return %0, %c0_i32, %c0_i32_0 : i32, i32, i32
  }
  func.func @transform_2(%arg0: i32) -> (i32, i32, i32) {
    %c0_i32 = arith.constant 0 : i32
    %c0_i32_0 = arith.constant 0 : i32
    %c0_i32_1 = arith.constant 0 : i32
    return %arg0, %c0_i32, %c0_i32_0 : i32, i32, i32
  }
  func.func @transform_3(%arg0: i32) -> (i32, i32, i32) {
    %c1_i32 = arith.constant 1 : i32
    %0 = arith.subi %c1_i32, %arg0 : i32
    %c0_i32 = arith.constant 0 : i32
    %c0_i32_0 = arith.constant 0 : i32
    %c0_i32_1 = arith.constant 0 : i32
    return %0, %c0_i32, %c0_i32_0 : i32, i32, i32
  }
  func.func @transform_4(%arg0: i32) -> (i32, i32) {
    %c0_i32 = arith.constant 0 : i32
    %c0_i32_0 = arith.constant 0 : i32
    %c0_i32_1 = arith.constant 0 : i32
    return %c0_i32, %c0_i32_0 : i32, i32
  }
  func.func @transform_5(%arg0: i32) -> (i32, i32) {
    %c0_i32 = arith.constant 0 : i32
    %c0_i32_0 = arith.constant 0 : i32
    %c0_i32_1 = arith.constant 0 : i32
    return %c0_i32, %c0_i32_0 : i32, i32
  }
  func.func @transform_6(%arg0: i32) -> (i32, i32, i32) {
    %c0_i32 = arith.constant 0 : i32
    %c0_i32_0 = arith.constant 0 : i32
    %c0_i32_1 = arith.constant 0 : i32
    return %arg0, %c0_i32, %c0_i32_0 : i32, i32, i32
  }
  func.func @transform_7(%arg0: i32) -> (i32, i32, i32) {
    %c1_i32 = arith.constant 1 : i32
    %0 = arith.subi %c1_i32, %arg0 : i32
    %c0_i32 = arith.constant 0 : i32
    %c0_i32_0 = arith.constant 0 : i32
    %c0_i32_1 = arith.constant 0 : i32
    return %0, %c0_i32, %c0_i32_0 : i32, i32, i32
  }
  func.func @transform_8(%arg0: i32) -> (i32, i32) {
    %c0_i32 = arith.constant 0 : i32
    %c0_i32_0 = arith.constant 0 : i32
    %c0_i32_1 = arith.constant 0 : i32
    return %c0_i32, %c0_i32_0 : i32, i32
  }
  func.func @transform_9(%arg0: i32) -> (i32, i32) {
    %c0_i32 = arith.constant 0 : i32
    %c0_i32_0 = arith.constant 0 : i32
    %c0_i32_1 = arith.constant 0 : i32
    return %c0_i32, %c0_i32_0 : i32, i32
  }
}

</mosaic_0001>

<bundles_post_ra>
// kernel: tpu_custom_call.1
= control target key start
LH: loop header
LB: loop body
LE: loop exit
PB: predicated region body
PF: predicated region fallthrough
CT: control target
= control target key end

     0   :  { %s2765_s0 = inlined_call_operand.vmem [shape: f32[8,2,128], index: 0, kind: input, shape index: {}]   ;;  %s2766_s1 = inlined_call_operand.vmem [shape: f32[8,2,128], index: 1, kind: input, shape index: {}]   ;;  %s2767_s2 = inlined_call_operand.vmem [shape: f32[8,2,1], index: 2, kind: input, shape index: {}]   ;;  %s2768_s3 = inlined_call_operand.vmem [shape: f32[8,2,1], index: 3, kind: input, shape index: {}]   ;;  %s2769_s4 = inlined_call_operand.vmem [shape: bf16[32,128], index: 4, kind: input, shape index: {}]   ;;  %s2770_s5 = inlined_call_operand.hbm [shape: bf16[32,128], index: 5, kind: input, shape index: {}]   ;;  %s2771_s6 = inlined_call_operand.hbm [shape: f32[8,2,32], index: 6, kind: output, shape index: {0}]   ;;  %s2772_s7 = inlined_call_operand.hbm [shape: f32[8,2,32], index: 7, kind: output, shape index: {1}]   ;;  %s2773_s8 = inlined_call_operand.hbm [shape: f32[2,32], index: 8, kind: output, shape index: {2}]   ;;  %s2774_s9 = inlined_call_operand.hbm [shape: f32[2,32], index: 9, kind: output, shape index: {3}]  }
   0x1   :  { %2793 = sst [smem:[#allocation30_spill]] %s2770_s5 }
   0x2   :  { %15 = vsyncpa [#allocation7], 0 }
   0x3   :  { %16 = vsyncpa [#allocation8], 0 }
   0x4   :  { %18 = vsyncpa [#allocation8 + $0x1], 0 }
   0x5   :  { %19 = vsyncpa [#allocation11], 0 }
   0x6   :  { %21 = vsyncpa [#allocation11 + $0x1], 0 }
   0x7   :  { %22 = vsyncpa [#allocation14], 0  ;;  %s2109_s30 = smov 0   ;;  %s2111_s10 = smov 0  }
   0x8   :  { %s2113_s11 = smov 0   ;;  %s2115_s12 = smov 0  }
   0x9   :  { %s2117_s13 = smov 0   ;;  %s2119_s14 = smov 0  }
   0xa   :  { %s2121_s15 = smov 0  }
   0xb LB: > { %2794 = sst [smem:[#allocation20_spill]] %s2022_s10  ;;  %s2145_s16 = sadd.s32 4294967295, %s2042_s15   ;;  %s2042_s15 = sphi %s2121_s15, %s2837_s15   ;;  %s2038_s14 = sphi %s2119_s14, %s2842_s14   ;;  %s2034_s13 = sphi %s2117_s13, %s2844_s13   ;;  %s2030_s12 = sphi %s2115_s12, %s2843_s12   ;;  %s2026_s11 = sphi %s2113_s11, %s2840_s11   ;;  %s2022_s10 = sphi %s2111_s10, %s2839_s10   ;;  %s2018_s30 = sphi %s2109_s30, %s2838_s30  }
   0xc   : > { %2795 = sst [smem:[#allocation21_spill]] %s2026_s11  ;;  %s2775_s17 = sadd.s32 4294967294, %s2042_s15  }
   0xd   : > { %2796 = sst [smem:[#allocation22_spill]] %s2030_s12  ;;  %s2149_s18 = sadd.s32 1, %s2042_s15  }
   0xe   : > { %2797 = sst [smem:[#allocation23_spill]] %s2038_s14  ;;  %s185_s19 = sadd.s32 1, %s2038_s14 }
   0xf   : > { %2798 = sst [smem:[#allocation24_spill]] %s2042_s15  ;;  %s182_s20 = ssub.s32 %s2042_s15, %s2149_s18 }
  0x10   : > { %2799 = sst [smem:[#allocation25_spill]] %s2149_s18  ;;  %p195_p0 = scmp.ne.s32.totalorder %s2038_s14, %s2034_s13 }
  0x11   : > { %p183_p1 = scmp.eq.s32.totalorder %s182_s20, 0  ;;  %p2777_p2 = scmp.eq.s32.totalorder %s2145_s16, 1 }
  0x12   : > { %p201_p3 = scmp.ne.s32.totalorder %s2034_s13, %s2030_s12  ;;  %p2161_p4 = scmp.eq.s32.totalorder %s2775_s17, 1 }
  0x13   : > { %s2166_s22 = scalar_select %p183_p1, %s2038_s14, %s185_s19  }
  0x14   : > { %p2170_p5 = por %p2777_p2, %p195_p0  ;;  %p2176_p6 = por %p2161_p4, %p201_p3 }
  0x15   : > { %2801 = sst [smem:[#allocation26_spill]] %s2166_s22  ;;  %s208_s25 = ssub.s32 1, %s2042_s15 }
  0x16   : > { %s2802_s23 = scalar_select %p2170_p5, 1, 0 }
  0x17   : > { %s2803_s24 = scalar_select %p2176_p6, 1, 0 }
  0x18   : > { %s209_s26 = ssub.s32 1, %s2149_s18  ;;  %s213_s28 = sadd.s32 1, %s2026_s11 }
  0x19   : > { %2804 = sst [smem:[#allocation27_spill]] %s2803_s24  ;;  %s210_s27 = ssub.s32 %s208_s25, %s209_s26 }
  0x1a   : > { %p211_p7 = scmp.eq.s32.totalorder %s210_s27, 0  ;;  %p223_p8 = scmp.ne.s32.totalorder %s2026_s11, %s2022_s10 }
  0x1b   : > { %p229_p9 = scmp.ne.s32.totalorder %s2022_s10, %s2018_s30  ;;  %p1503_p10 = scmp.ge.s32.totalorder %s2042_s15, 1 }
  0x1c   : > { %s2189_s29 = scalar_select %p211_p7, %s2026_s11, %s213_s28  }
  0x1d   : > { %p2193_p11 = por %p223_p8, %p2777_p2  ;;  %p2199_p12 = por %p229_p9, %p2161_p4 }
  0x1e   : > { %2805 = sst [smem:[#allocation28_spill]] %s2189_s29  ;;  %p279_p13 = scmp.lt.s32.totalorder %s2042_s15, 3 }
  0x1f   : > { %s2806_s19 = scalar_select %p2193_p11, 1, 0 }
  0x20   : > { %s2807_s20 = scalar_select %p2199_p12, 1, 0 }
  0x21   : > { %p2779_p1 = scmp.eq.s32.totalorder %s2145_s16, 0  ;;  %p2206_p3 = pnand %p1503_p10, %p279_p13 }
  0x22   : > { %2808 = sst [smem:[#allocation29_spill]] %s2807_s20  ;;  %s2044_s30 = smov [#allocation6]  }
  0x23   : > { %s2809_s25 = scalar_select %p2206_p3, 1, 0 }
  0x24   : > { %s294_s26 = sshll.u32 %s2044_s30, 4  ;;  %p1675_p7 = pneg %p2206_p3  ;;  %s295_s26 = int_to_ptr.vmem [resolvable:$true] %s294_s26 }
  0x25   : > { %s2811_s5 = sld [smem:[#allocation30_spill]] }
  0x26   : > { %p2214_p8 = pnand %p2779_p1, %p1675_p7 }
  0x28   : > { %p1834_p9 = pneg %p2214_p8 }
  0x2b   : > { %s1832_s17 = scalar_lea.hbm %s2811_s5, 256 }
  0x2c   : > { %p1833_p4 = scmp.ne.s32.totalorder %s2811_s5, %s1832_s17  ;;  %p1839_p7 = scmp.lt.u32.totalorder %s1832_s17, %s2811_s5 }
  0x2e   : > { %p1835_p10 = pnand %p1834_p9, %p1833_p4 }
  0x30   : > { %p1836_p13 = pneg %p1835_p10 }
  0x32   : > { %p1841_p2 = pnand %p1839_p7, %p1836_p13 }
  0x34   : > { %1844 = shalt.err (!%p1841_p2)
}
  0x35   : > { %s1845_s11 = scalar_lea.vmem %s295_s26, 256  ;;  %p1853_p6 = scmp.lt.s32.totalorder %s295_s26, %s295_s26 }
  0x36   : > { %p1846_p0 = scmp.ne.s32.totalorder %s295_s26, %s1845_s11  ;;  %p1854_p5 = scmp.lt.s32.totalorder %s1845_s11, %s1845_s11 }
  0x38   : > { %p1848_p1 = pnand %p1846_p0, %p1834_p9  ;;  %p1855_p11 = por %p1854_p5, %p1853_p6 }
  0x3a   : > { %p1849_p12 = pneg %p1848_p1 }
  0x3c   : > { %p1856_p3 = pnand %p1855_p11, %p1849_p12 }
  0x3e   : > { %1859 = shalt.err (!%p1856_p3)
}
  0x3f   : > { %s2045_s14 = smov 64   ;;  %s2046_s22 = smov 4  }
  0x40   : > { %1678 = dma.hbm_to_vmem [thread:$0]  (!%p2214_p8), %s2811_s5, 256, %s295_s26, [#allocation7], %s2045_s14, %s2045_s14, %s2046_s22  }
  0x41   : > { %p2812_p4 = scmp.ne.s32.totalorder %s2809_s25, 0 }
  0x42   : > { %p2813_p2 = scmp.eq.s32.totalorder (!%p2812_p4), %s2145_s16, 0 }
  0x43   : > { %350 = sbr.rel (%p2812_p4) target bundleno = 2993 (0xbb1), region = 44 }
  0x4a   : > { %1997 = dma.done.wait (%p2813_p2), [#allocation7], 256   ;;  %p2814_p0 = pmov %p2813_p2 }
  0x4b   : > { %s2786_s11 = sand.u32 1, %s2034_s13   ;;  %s401_s17 = sand.u32 1, %s2022_s10  }
  0x4c   : > { %1999 = vsyncadd (%p2814_p0), [#allocation7], 4294967040  ;;  %s1508_s29 = sshll.u32 %s2786_s11, 3  ;;  %s1509_s26 = sshll.u32 %s401_s17, 3 }
  0x4d   : > { %s1510_s21 = sshll.u32 %s2145_s16, 2  ;;  %s2789_s25 = ssub.s32 1, %s2145_s16 }
  0x4e   : > { %p409_p5 = scmp.lt.s32.totalorder %s1510_s21, 7  ;;  %s1512_s30 = sshll.u32 %s2789_s25, 2 }
  0x4f   : > { %p416_p6 = scmp.lt.s32.totalorder %s1512_s30, 7  ;;  %s2268_s15 = scalar_lea.vmem [#allocation9], %s1508_s29 }
  0x50   : > { %s2846_s21 = smov (!%p409_p5, %s1510_s21), 7  ;;  %s2270_s22 = scalar_lea.vmem [#allocation10], %s1509_s26 }
  0x51   : > { %s2848_s30 = smov (!%p416_p6, %s1512_s30), 7  ;;  %s1511_s14 = sshll.u32 %s2846_s21, 1 }
  0x52   : > { %s2251_s28 = scalar_lea.vmem %s2765_s0, %s1511_s14  ;;  %s1513_s5 = sshll.u32 %s2848_s30, 1 }
  0x53   : > { %s2256_s11 = scalar_lea.vmem %s2766_s1, %s1513_s5  ;;  %s2261_s24 = scalar_lea.vmem %s2767_s2, %s1511_s14 }
  0x54   : > { %s2266_s21 = scalar_lea.vmem %s2768_s3, %s1513_s5  ;;  %p2815_p11 = scmp.ne.s32.totalorder %s2145_s16, 0 }
  0x55   : > { %vm444_vm0 = vcmask (!%p2815_p11), 254976   ;;  %v2047_v0 = vmov (!%p2815_p11), 0.0  }
  0x56   : > { %443 = sbr.rel (%p2815_p11) target bundleno = 93 (0x5d), region = 52  ;;  %445 = vst.msk [vmem:[#allocation2] sm:$0x3] (!%p2815_p11), %vm444_vm0, %v2047_v0  ;;  %446 = vst.msk [vmem:[#allocation3] sm:$0x3] (!%p2815_p11), %vm444_vm0, %v2047_v0 }
  0x57   : > { %447 = vst.msk [vmem:[#allocation4] sm:$0x3] (!%p2815_p11), %vm444_vm0, %v2047_v0  ;;  %448 = vst.msk [vmem:[#allocation5] sm:$0x3] (!%p2815_p11), %vm444_vm0, %v2047_v0 }
  0x5d PF: > { %v2274_v1 = vld [vmem:[#allocation6] sm:$0xff]   ;;  %v2048_v2 = vmov 0.0   ;;  %v2281_v3 = vld [vmem:[%s2769_s4] sm:$0xff]   ;;  %v2284_v4 = vld [vmem:[#allocation6 + $0x8] sm:$0xff]   ;;  %vm2049_vm1 = vmmov 0   ;;  %s2050_s20 = smov 32  }
  0x5e   : > { %1603 = vmatprep.subr.bf16.mxu1 %v2048_v2  ;;  %1595 = vmatprep.subr.bf16.mxu0 %v2048_v2  ;;  %v2293_v5 = vld [vmem:[%s2769_s4 + $0x8] sm:$0xff]   ;;  %v2298_v6 = vld [vmem:[#allocation4] sm:$0x3]  ;;  %v2300_v7 = vld [vmem:[#allocation2] sm:$0x3]  ;;  %vm476_vm2 = vcmask 261120  }
  0x5f   : > { %1604 = vmatpush3.bf16.msra.mxu1 %v2274_v1  ;;  %1607 = vmatprep.mubr.msk.bf16.mxu1 %vm2049_vm1, %v2048_v2  ;;  %v460_v8 = vld [vmem:[#allocation5] sm:$0x3]  ;;  %v577_v9 = vpack.c.bf16 %v2298_v6, %v2298_v6  ;;  %v463_v10 = vpack.c.bf16 %v2300_v7, %v2300_v7  ;;  %v458_v11 = vld [vmem:[#allocation3] sm:$0x3]  ;;  %v462_v13 = vld [vmem:[%s2251_s28] sm:$0x3] }
  0x60   : > { %1596 = vmatpush3.bf16.msra.mxu0 %v2281_v3  ;;  %1605 = vmatprep.subr.bf16.mxu1 %v2048_v2  ;;  %v1524_v12 = vld [vmem:[%s2256_s11 + $0x6] sm:$0x3]  ;;  %v2051_v24 = vmov 0   ;;  %s2052_s29 = smov 64   ;;  %v2337_v37 = vld [vmem:[%s2261_s24] sm:$0x3] }
  0x61   : > { %1597 = vmatprep.subr.bf16.mxu0 %v2048_v2  ;;  %1599 = vmatprep.mubr.msk.bf16.mxu0 %vm2049_vm1, %v2048_v2  ;;  %v2333_v33 = vld [vmem:[%s2266_s21 + $0x6] sm:$0x3]  ;;  %vm549_vm4 = vcmp.gt.f32.partialorder %v2337_v37, 0.0  ;;  %s2053_s26 = smov 96   ;;  %p2816_p1 = scmp.eq.s32.totalorder %s2145_s16, 1 }
  0x62   : > { %642 = vrot.lane.b32.xlu1 %v460_v8, %s2050_s20  ;;  %1762 = vset.pattern.permute.xlu0 %v2051_v24  ;;  %vm662_vm3 = vcmp.gt.f32.partialorder %v2333_v33, 0.0  ;;  %v550_v42 = vsel %vm549_vm4, 1, %v2051_v24  ;;  %v1536_v8 = vld [vmem:[%s2256_s11 + $0x4] sm:$0x3] }
  0x63   : > { %1606 = vmatpush3.bf16.msra.mxu1 %v2284_v4  ;;  %1763 = vset.pattern.permute.xlu1 %v2051_v24  ;;  %v663_v40 = vsel %vm662_vm3, 1, %v2051_v24  ;;  %vm571_vm3 = vcmask 254976  }
  0x64   : > { %1598 = vmatpush3.bf16.msra.mxu0 %v2293_v5  ;;  %1619 = vmatprep.subr.bf16.mxu1 %v2048_v2 }
  0x65   : > { %1611 = vmatprep.subr.bf16.mxu0 %v2048_v2 }
  0x66   : > { %1608 = vmatmul.mubr.msk.bf16.vlgmr.msra.gmra.mrb[0].mxu1 %vm476_vm2, %v577_v9  ;;  %529 = vrot.lane.b32.xlu1 %v458_v11, %s2050_s20 }
  0x67   : > { %1600 = vmatmul.mubr.msk.bf16.vlgmr.msra.gmra.mrb[0].mxu0 %vm476_vm2, %v463_v10  ;;  %1620 = vmatpush3.bf16.msra.mxu1 %v2274_v1 }
  0x68   : > { %1621 = vmatprep.subr.bf16.mxu1 %v2048_v2  ;;  %1612 = vmatpush3.bf16.msra.mxu0 %v2281_v3 }
  0x69   : > { %1613 = vmatprep.subr.bf16.mxu0 %v2048_v2  ;;  %1623 = vmatprep.mubr.msk.bf16.mxu1 %vm2049_vm1, %v2048_v2 }
  0x6a   : > { %1615 = vmatprep.mubr.msk.bf16.mxu0 %vm2049_vm1, %v2048_v2 }
  0x6b   : > { %1622 = vmatpush3.bf16.msra.mxu1 %v2284_v4 }
  0x6c   : > { %1614 = vmatpush3.bf16.msra.mxu0 %v2293_v5  ;;  %1635 = vmatprep.subr.bf16.mxu1 %v2048_v2 }
  0x6d   : > { %1627 = vmatprep.subr.bf16.mxu0 %v2048_v2 }
  0xd4   : > { %v2344_v43 = vpop.permute.xlu1 %642 }
  0xd8   : > { %v2347_v45 = vpop.permute.xlu1 %529 }
 0x139   : > { %v627_v14 = vpop.f32.mrb[0].mxu1 }
 0x13a   : > { %v633_v15 = vadd.f32 %v1524_v12, %v627_v14  ;;  %v514_v16 = vpop.f32.mrb[0].mxu0  ;;  %v1609_v17 = vpop.f32.mrb[1].mxu1 }
 0x13b   : > { %v520_v18 = vadd.f32 %v514_v16, %v462_v13  ;;  %v1601_v19 = vpop.f32.mrb[1].mxu0  ;;  %v630_v20 = vpop.f32.mrb[2].mxu1  ;;  %v1531_v13 = vld [vmem:[%s2251_s28 + $0x2] sm:$0x3] }
 0x13c   : > { %1768 = vtanh.f32 %v633_v15  ;;  %v517_v21 = vpop.f32.mrb[2].mxu0  ;;  %v1610_v22 = vpop.f32.mrb[3].mxu1  ;;  %v1528_v27 = vmul.f32 -1.442695, %v633_v15 }
 0x13d   : > { %v1602_v23 = vpop.f32.mrb[3].mxu0  ;;  %1770 = vtanh.f32 %v520_v18  ;;  %v1522_v28 = vmul.f32 -1.442695, %v520_v18 }
 0x13e   : > { %1772 = vpow2.f32 %v1528_v27 }
 0x13f   : > { %1774 = vpow2.f32 %v1522_v28 }
 0x146   : > { %v1769_v25 = vpop.eup %1768 }
 0x147   : > { %647 = vrot.lane.b32.xlu0 %v1769_v25, %s2052_s29  ;;  %v1771_v26 = vpop.eup %1770 }
 0x148   : > { %v1773_v29 = vpop.eup %1772 }
 0x149   : > { %v637_v30 = vadd.f32 1.0, %v1773_v29  ;;  %v1775_v31 = vpop.eup %1774  ;;  %v2401_v29 = vld [vmem:[%s2266_s21 + $0x4] sm:$0x3] }
 0x14a   : > { %v524_v32 = vadd.f32 1.0, %v1775_v31  ;;  %vm858_vm7 = vcmp.gt.f32.partialorder %v2401_v29, 0.0 }
 0x14b   : > { %534 = vrot.lane.b32.xlu0 %v1771_v26, %s2052_s29  ;;  %1776 = vrcp.f32 %v637_v30 }
 0x14c   : > { %1778 = vrcp.f32 %v524_v32 }
 0x155   : > { %v1777_v34 = vpop.eup %1776 }
 0x156   : > { %v1779_v38 = vpop.eup %1778  ;;  %v645_v44 = vmul.f32 %v1777_v34, %v2344_v43 }
 0x157   : > { %v532_v48 = vmul.f32 %v1779_v38, %v2347_v45 }
 0x1b9   : > { %v648_v35 = vpop.permute.xlu0 %647 }
 0x1ba   : > { %v650_v36 = vmul.f32 %v1777_v34, %v648_v35 }
 0x1bc   : > { %652 = vrot.lane.b32.xlu0 %v650_v36, %s2050_s20 }
 0x1bd   : > { %v535_v39 = vpop.permute.xlu0 %534 }
 0x1be   : > { %v537_v41 = vmul.f32 %v1779_v38, %v535_v39 }
 0x1c0   : > { %665 = vperm.xlu0 %1762, %v663_v40   ;;  %539 = vrot.lane.b32.xlu1 %v537_v41, %s2050_s20 }
 0x1c4   : > { %552 = vperm.xlu1 %1763, %v550_v42  }
 0x22e   : > { %v653_v46 = vpop.permute.xlu0 %652 }
 0x22f   : > { %v2349_v47 = vadd.f32 %v653_v46, %v645_v44 }
 0x231   : > { %1780 = vtanh.f32 %v2349_v47 }
 0x232   : > { %v540_v49 = vpop.permute.xlu1 %539 }
 0x233   : > { %v2353_v50 = vadd.f32 %v540_v49, %v532_v48 }
 0x235   : > { %1782 = vtanh.f32 %v2353_v50 }
 0x23b   : > { %v1781_v51 = vpop.eup %1780 }
 0x23c   : > { %658 = vrot.lane.b32.xlu1 %v1781_v51, %s2052_s29 }
 0x23f   : > { %v1783_v52 = vpop.eup %1782  ;;  %v2364_v54 = vpop.permute.xlu0 %665 }
 0x240   : > { %669 = vrot.lane.b32.xlu1 %v2298_v6, %s2053_s26  ;;  %545 = vrot.lane.b32.xlu0 %v1783_v52, %s2052_s29  ;;  %vm667_vm5 = vcmp.eq.s32.totalorder %v2364_v54, 1 }
 0x241   : > { %v2416_v41 = vsel %vm667_vm5, %v2349_v47, %v2344_v43 }
 0x243   : > { %v2362_v53 = vpop.permute.xlu1 %552 }
 0x244   : > { %556 = vrot.lane.b32.xlu0 %v2300_v7, %s2053_s26  ;;  %vm554_vm6 = vcmp.eq.s32.totalorder %v2362_v53, 1 }
 0x245   : > { %v2425_v48 = vsel %vm554_vm6, %v2353_v50, %v2347_v45 }
 0x2ae   : > { %v659_v55 = vpop.permute.xlu1 %658 }
 0x2af   : > { %v661_v56 = vmul.f32 %v1777_v34, %v659_v55  ;;  %v2405_v34 = vld [vmem:[%s2261_s24 + $0x2] sm:$0x3] }
 0x2b0   : > { %vm762_vm8 = vcmp.gt.f32.partialorder %v2405_v34, 0.0 }
 0x2b1   : > { %v763_v40 = vsel %vm762_vm8, 1, %v2051_v24 }
 0x2b2   : > { %v670_v57 = vpop.permute.xlu1 %669  ;;  %v546_v58 = vpop.permute.xlu0 %545 }
 0x2b3   : > { %v2369_v59 = vsel %vm667_vm5, %v661_v56, %v670_v57  ;;  %v548_v61 = vmul.f32 %v1779_v38, %v546_v58  ;;  %v859_v38 = vsel %vm858_vm7, 1, %v2051_v24 }
 0x2b4   : > { %v786_v60 = vpack.c.bf16 %v2369_v59, %v2369_v59 }
 0x2b6   : > { %788 = vrot.lane.b32.xlu1 %v786_v60, %s2050_s20  ;;  %v557_v62 = vpop.permute.xlu0 %556 }
 0x2b7   : > { %v2377_v63 = vsel %vm554_vm6, %v548_v61, %v557_v62 }
 0x2b8   : > { %v690_v0 = vpack.c.bf16 %v2377_v63, %v2377_v63 }
 0x2ba   : > { %692 = vrot.lane.b32.xlu0 %v690_v0, %s2050_s20 }
 0x328   : > { %v789_v6 = vpop.permute.xlu1 %788 }
 0x329   : > { %1624 = vmatmul.mubr.msk.bf16.vlgmr.msra.gmra.mrb[4].mxu1 %vm476_vm2, %v789_v6 }
 0x32a   : > { %1636 = vmatpush3.bf16.msra.mxu1 %v2274_v1  ;;  %1639 = vmatprep.mubr.msk.bf16.mxu1 %vm2049_vm1, %v2048_v2 }
 0x32b   : > { %1637 = vmatprep.subr.bf16.mxu1 %v2048_v2 }
 0x32c   : > { %v693_v7 = vpop.permute.xlu0 %692 }
 0x32d   : > { %1616 = vmatmul.mubr.msk.bf16.vlgmr.msra.gmra.mrb[4].mxu0 %vm476_vm2, %v693_v7 }
 0x32e   : > { %1628 = vmatpush3.bf16.msra.mxu0 %v2281_v3  ;;  %1638 = vmatpush3.bf16.msra.mxu1 %v2284_v4 }
 0x32f   : > { %1629 = vmatprep.subr.bf16.mxu0 %v2048_v2  ;;  %1631 = vmatprep.mubr.msk.bf16.mxu0 %vm2049_vm1, %v2048_v2 }
 0x330   : > { %1651 = vmatprep.subr.bf16.mxu1 %v2048_v2 }
 0x332   : > { %1630 = vmatpush3.bf16.msra.mxu0 %v2293_v5 }
 0x333   : > { %1643 = vmatprep.subr.bf16.mxu0 %v2048_v2 }
 0x3fc   : > { %v827_v9 = vpop.f32.mrb[4].mxu1 }
 0x3fd   : > { %v833_v10 = vadd.f32 %v1536_v8, %v827_v9  ;;  %v1625_v11 = vpop.f32.mrb[5].mxu1 }
 0x3fe   : > { %v830_v12 = vpop.f32.mrb[6].mxu1 }
 0x3ff   : > { %1784 = vtanh.f32 %v833_v10  ;;  %v1626_v14 = vpop.f32.mrb[7].mxu1  ;;  %v1538_v22 = vmul.f32 -1.442695, %v833_v10  ;;  %v1541_v10 = vld [vmem:[%s2251_s28 + $0x4] sm:$0x3] }
 0x400   : > { %v731_v15 = vpop.f32.mrb[4].mxu0 }
 0x401   : > { %v737_v16 = vadd.f32 %v1531_v13, %v731_v15  ;;  %v1617_v17 = vpop.f32.mrb[5].mxu0 }
 0x402   : > { %v734_v18 = vpop.f32.mrb[6].mxu0 }
 0x403   : > { %1786 = vtanh.f32 %v737_v16  ;;  %v1618_v19 = vpop.f32.mrb[7].mxu0  ;;  %v1533_v23 = vmul.f32 -1.442695, %v737_v16 }
 0x404   : > { %1788 = vpow2.f32 %v1538_v22 }
 0x405   : > { %1790 = vpow2.f32 %v1533_v23 }
 0x409   : > { %v1785_v20 = vpop.eup %1784 }
 0x40a   : > { %843 = vrot.lane.b32.xlu1 %v1785_v20, %s2052_s29 }
 0x40d   : > { %v1787_v21 = vpop.eup %1786 }
 0x40e   : > { %747 = vrot.lane.b32.xlu0 %v1787_v21, %s2052_s29  ;;  %v1789_v25 = vpop.eup %1788  ;;  %v2473_v21 = vld [vmem:[%s2266_s21 + $0x2] sm:$0x3] }
 0x40f   : > { %v837_v26 = vadd.f32 1.0, %v1789_v25  ;;  %v1791_v27 = vpop.eup %1790  ;;  %vm1050_vm11 = vcmp.gt.f32.partialorder %v2473_v21, 0.0 }
 0x410   : > { %v741_v28 = vadd.f32 1.0, %v1791_v27 }
 0x411   : > { %1792 = vrcp.f32 %v837_v26  ;;  %v2477_v26 = vld [vmem:[%s2261_s24 + $0x4] sm:$0x3] }
 0x412   : > { %1794 = vrcp.f32 %v741_v28  ;;  %vm954_vm12 = vcmp.gt.f32.partialorder %v2477_v26, 0.0 }
 0x41b   : > { %v1793_v30 = vpop.eup %1792 }
 0x41c   : > { %v1795_v35 = vpop.eup %1794  ;;  %v841_v42 = vmul.f32 %v1793_v30, %v2416_v41 }
 0x41d   : > { %v745_v49 = vmul.f32 %v1795_v35, %v2425_v48 }
 0x47c   : > { %v844_v31 = vpop.permute.xlu1 %843 }
 0x47d   : > { %v846_v32 = vmul.f32 %v1793_v30, %v844_v31 }
 0x47f   : > { %848 = vrot.lane.b32.xlu1 %v846_v32, %s2050_s20  ;;  %v955_v32 = vsel %vm954_vm12, 1, %v2051_v24 }
 0x480   : > { %v748_v36 = vpop.permute.xlu0 %747 }
 0x481   : > { %v750_v39 = vmul.f32 %v1795_v35, %v748_v36 }
 0x483   : > { %861 = vperm.xlu1 %1763, %v859_v38   ;;  %752 = vrot.lane.b32.xlu0 %v750_v39, %s2050_s20 }
 0x487   : > { %765 = vperm.xlu0 %1762, %v763_v40  }
 0x4f1   : > { %v849_v44 = vpop.permute.xlu1 %848 }
 0x4f2   : > { %v2419_v46 = vadd.f32 %v849_v44, %v841_v42 }
 0x4f4   : > { %1796 = vtanh.f32 %v2419_v46 }
 0x4f5   : > { %v753_v51 = vpop.permute.xlu0 %752 }
 0x4f6   : > { %v2429_v52 = vadd.f32 %v753_v51, %v745_v49 }
 0x4f8   : > { %1798 = vtanh.f32 %v2429_v52 }
 0x4fe   : > { %v1797_v43 = vpop.eup %1796 }
 0x4ff   : > { %854 = vrot.lane.b32.xlu1 %v1797_v43, %s2052_s29 }
 0x502   : > { %v1799_v47 = vpop.eup %1798  ;;  %v2434_v54 = vpop.permute.xlu1 %861 }
 0x503   : > { %758 = vrot.lane.b32.xlu0 %v1799_v47, %s2052_s29  ;;  %vm863_vm9 = vcmp.eq.s32.totalorder %v2434_v54, 1 }
 0x506   : > { %v2436_v53 = vpop.permute.xlu0 %765 }
 0x507   : > { %vm767_vm10 = vcmp.eq.s32.totalorder %v2436_v53, 1 }
 0x508   : > { %v2497_v40 = vsel %vm767_vm10, %v2429_v52, %v2425_v48 }
 0x571   : > { %v855_v45 = vpop.permute.xlu1 %854 }
 0x572   : > { %v857_v50 = vmul.f32 %v1793_v30, %v855_v45  ;;  %v1051_v30 = vsel %vm1050_vm11, 1, %v2051_v24 }
 0x574   : > { %v2442_v55 = vsel %vm863_vm9, %v857_v50, %v2369_v59 }
 0x575   : > { %v759_v56 = vpop.permute.xlu0 %758  ;;  %v978_v57 = vpack.c.bf16 %v2442_v55, %v2442_v55 }
 0x576   : > { %v761_v58 = vmul.f32 %v1795_v35, %v759_v56  ;;  %v2488_v35 = vsel %vm863_vm9, %v2419_v46, %v2416_v41 }
 0x577   : > { %980 = vrot.lane.b32.xlu1 %v978_v57, %s2050_s20 }
 0x578   : > { %v2451_v60 = vsel %vm767_vm10, %v761_v58, %v2377_v63 }
 0x579   : > { %v882_v61 = vpack.c.bf16 %v2451_v60, %v2451_v60 }
 0x57b   : > { %884 = vrot.lane.b32.xlu0 %v882_v61, %s2050_s20  ;;  %v1167_v61 = vld [vmem:[%s2256_s11] sm:$0x3] }
 0x5e9   : > { %v981_v62 = vpop.permute.xlu1 %980 }
 0x5ea   : > { %1640 = vmatmul.mubr.msk.bf16.vlgmr.msra.gmra.mrb[8].mxu1 %vm476_vm2, %v981_v62 }
 0x5eb   : > { %1652 = vmatpush3.bf16.msra.mxu1 %v2274_v1  ;;  %1655 = vmatprep.mubr.msk.bf16.mxu1 %vm2049_vm1, %v2048_v2  ;;  %v1546_v1 = vld [vmem:[%s2256_s11 + $0x2] sm:$0x3] }
 0x5ec   : > { %1653 = vmatprep.subr.bf16.mxu1 %v2048_v2 }
 0x5ed   : > { %v885_v0 = vpop.permute.xlu0 %884 }
 0x5ee   : > { %1632 = vmatmul.mubr.msk.bf16.vlgmr.msra.gmra.mrb[8].mxu0 %vm476_vm2, %v885_v0 }
 0x5ef   : > { %1644 = vmatpush3.bf16.msra.mxu0 %v2281_v3  ;;  %1654 = vmatpush3.bf16.msra.mxu1 %v2284_v4 }
 0x5f0   : > { %1645 = vmatprep.subr.bf16.mxu0 %v2048_v2  ;;  %1647 = vmatprep.mubr.msk.bf16.mxu0 %vm2049_vm1, %v2048_v2 }
 0x5f3   : > { %1646 = vmatpush3.bf16.msra.mxu0 %v2293_v5 }
 0x6bd   : > { %v1019_v6 = vpop.f32.mrb[8].mxu1 }
 0x6be   : > { %v1025_v7 = vadd.f32 %v1546_v1, %v1019_v6  ;;  %v1641_v8 = vpop.f32.mrb[9].mxu1 }
 0x6bf   : > { %v1022_v9 = vpop.f32.mrb[10].mxu1 }
 0x6c0   : > { %1800 = vtanh.f32 %v1025_v7  ;;  %v1642_v11 = vpop.f32.mrb[11].mxu1  ;;  %v1548_v5 = vmul.f32 -1.442695, %v1025_v7  ;;  %v1551_v7 = vld [vmem:[%s2251_s28 + $0x6] sm:$0x3] }
 0x6c1   : > { %v923_v12 = vpop.f32.mrb[8].mxu0 }
 0x6c2   : > { %v929_v13 = vadd.f32 %v1541_v10, %v923_v12  ;;  %v1633_v3 = vpop.f32.mrb[9].mxu0 }
 0x6c3   : > { %v926_v14 = vpop.f32.mrb[10].mxu0 }
 0x6c4   : > { %1802 = vtanh.f32 %v929_v13  ;;  %v1634_v4 = vpop.f32.mrb[11].mxu0  ;;  %v1543_v16 = vmul.f32 -1.442695, %v929_v13 }
 0x6c5   : > { %1804 = vpow2.f32 %v1548_v5 }
 0x6c6   : > { %1806 = vpow2.f32 %v1543_v16 }
 0x6ca   : > { %v1801_v15 = vpop.eup %1800 }
 0x6cb   : > { %1035 = vrot.lane.b32.xlu1 %v1801_v15, %s2052_s29 }
 0x6ce   : > { %v1803_v2 = vpop.eup %1802 }
 0x6cf   : > { %939 = vrot.lane.b32.xlu0 %v1803_v2, %s2052_s29  ;;  %v1805_v17 = vpop.eup %1804 }
 0x6d0   : > { %v1029_v18 = vadd.f32 1.0, %v1805_v17  ;;  %v1807_v19 = vpop.eup %1806 }
 0x6d1   : > { %v933_v20 = vadd.f32 1.0, %v1807_v19 }
 0x6d2   : > { %1808 = vrcp.f32 %v1029_v18  ;;  %v1166_v18 = vld [vmem:[%s2266_s21] sm:$0x3] }
 0x6d3   : > { %1810 = vrcp.f32 %v933_v20  ;;  %vm1240_vm15 = vcmp.gt.f32.partialorder %v1166_v18, 0.0 }
 0x6dc   : > { %v1809_v22 = vpop.eup %1808 }
 0x6dd   : > { %v1811_v27 = vpop.eup %1810  ;;  %v1033_v36 = vmul.f32 %v1809_v22, %v2488_v35 }
 0x6de   : > { %v937_v42 = vmul.f32 %v1811_v27, %v2497_v40 }
 0x73d   : > { %v1036_v23 = vpop.permute.xlu1 %1035 }
 0x73e   : > { %v1038_v25 = vmul.f32 %v1809_v22, %v1036_v23  ;;  %v1550_v23 = vld [vmem:[%s2261_s24 + $0x6] sm:$0x3]  ;;  %s2054_s24 = smov [#allocation13]  }
 0x73f   : > { %vm1146_vm0 = vcmp.gt.f32.partialorder %v1550_v23, 0.0  ;;  %s1342_s11 = sshll.u32 %s2054_s24, 4  ;;  %s1343_s11 = int_to_ptr.vmem [resolvable:$true] %s1342_s11 }
 0x740   : > { %1040 = vrot.lane.b32.xlu1 %v1038_v25, %s2050_s20  ;;  %s1860_s25 = scalar_lea.vmem %s1343_s11, 32  ;;  %p1867_p9 = scmp.lt.s32.totalorder %s1343_s11, %s1343_s11 }
 0x741   : > { %v940_v28 = vpop.permute.xlu0 %939  ;;  %p1861_p12 = scmp.ne.s32.totalorder %s1343_s11, %s1860_s25  ;;  %p1868_p10 = scmp.lt.s32.totalorder %s1860_s25, %s1860_s25 }
 0x742   : > { %v942_v31 = vmul.f32 %v1811_v27, %v940_v28  ;;  %v1241_v28 = vsel %vm1240_vm15, 1, %v2051_v24 }
 0x743   : > { %p1862_p3 = pnand %p1861_p12, %p2816_p1  ;;  %p1869_p13 = por %p1868_p10, %p1867_p9 }
 0x744   : > { %1053 = vperm.xlu1 %1763, %v1051_v30   ;;  %944 = vrot.lane.b32.xlu0 %v942_v31, %s2050_s20  ;;  %v1147_v31 = vsel %vm1146_vm0, 1, %v2051_v24 }
 0x745   : > { %p1863_p8 = pneg %p1862_p3 }
 0x747   : > { %p1870_p7 = pnand %p1869_p13, %p1863_p8 }
 0x748   : > { %957 = vperm.xlu0 %1762, %v955_v32  }
 0x7b2   : > { %v1041_v38 = vpop.permute.xlu1 %1040 }
 0x7b3   : > { %v2491_v39 = vadd.f32 %v1041_v38, %v1033_v36 }
 0x7b5   : > { %1812 = vtanh.f32 %v2491_v39 }
 0x7b6   : > { %v945_v44 = vpop.permute.xlu0 %944 }
 0x7b7   : > { %v2501_v49 = vadd.f32 %v945_v44, %v937_v42 }
 0x7b9   : > { %1814 = vtanh.f32 %v2501_v49 }
 0x7bf   : > { %v1813_v41 = vpop.eup %1812 }
 0x7c0   : > { %1046 = vrot.lane.b32.xlu1 %v1813_v41, %s2052_s29 }
 0x7c3   : > { %v1815_v46 = vpop.eup %1814  ;;  %v2506_v51 = vpop.permute.xlu1 %1053 }
 0x7c4   : > { %950 = vrot.lane.b32.xlu0 %v1815_v46, %s2052_s29  ;;  %vm1055_vm13 = vcmp.eq.s32.totalorder %v2506_v51, 1 }
 0x7c5   : > { %v1057_v24 = vsel %vm1055_vm13, %v2491_v39, %v2488_v35 }
 0x7c7   : > { %v2508_v43 = vpop.permute.xlu0 %957 }
 0x7c8   : > { %vm959_vm14 = vcmp.eq.s32.totalorder %v2508_v43, 1 }
 0x832   : > { %v1047_v48 = vpop.permute.xlu1 %1046 }
 0x833   : > { %v1049_v52 = vmul.f32 %v1809_v22, %v1047_v48 }
 0x835   : > { %v2514_v47 = vsel %vm1055_vm13, %v1049_v52, %v2442_v55 }
 0x836   : > { %v951_v54 = vpop.permute.xlu0 %950  ;;  %v1168_v53 = vpack.c.bf16 %v2514_v47, %v2514_v47 }
 0x837   : > { %v953_v45 = vmul.f32 %v1811_v27, %v951_v54 }
 0x838   : > { %1170 = vrot.lane.b32.xlu1 %v1168_v53, %s2050_s20 }
 0x839   : > { %v2523_v50 = vsel %vm959_vm14, %v953_v45, %v2451_v60 }
 0x83a   : > { %v1074_v56 = vpack.c.bf16 %v2523_v50, %v2523_v50 }
 0x83c   : > { %1076 = vrot.lane.b32.xlu0 %v1074_v56, %s2050_s20 }
 0x8aa   : > { %v1171_v57 = vpop.permute.xlu1 %1170 }
 0x8ab   : > { %1656 = vmatmul.mubr.msk.bf16.vlgmr.msra.gmra.mrb[12].mxu1 %vm476_vm2, %v1171_v57 }
 0x8ae   : > { %v1077_v58 = vpop.permute.xlu0 %1076 }
 0x8af   : > { %1648 = vmatmul.mubr.msk.bf16.vlgmr.msra.gmra.mrb[12].mxu0 %vm476_vm2, %v1077_v58 }
 0x97e   : > { %v1209_v62 = vpop.f32.mrb[12].mxu1 }
 0x97f   : > { %v1215_v0 = vadd.f32 %v1209_v62, %v1167_v61  ;;  %v1657_v1 = vpop.f32.mrb[13].mxu1 }
 0x980   : > { %v1212_v6 = vpop.f32.mrb[14].mxu1 }
 0x981   : > { %1816 = vtanh.f32 %v1215_v0  ;;  %v1658_v8 = vpop.f32.mrb[15].mxu1  ;;  %v1556_v4 = vmul.f32 -1.442695, %v1215_v0 }
 0x982   : > { %v1115_v9 = vpop.f32.mrb[12].mxu0 }
 0x983   : > { %v1121_v10 = vadd.f32 %v1551_v7, %v1115_v9  ;;  %v1649_v11 = vpop.f32.mrb[13].mxu0 }
 0x984   : > { %v1118_v12 = vpop.f32.mrb[14].mxu0 }
 0x985   : > { %1818 = vtanh.f32 %v1121_v10  ;;  %v1650_v13 = vpop.f32.mrb[15].mxu0  ;;  %v1553_v15 = vmul.f32 -1.442695, %v1121_v10 }
 0x986   : > { %1820 = vpow2.f32 %v1556_v4 }
 0x987   : > { %1822 = vpow2.f32 %v1553_v15 }
 0x98b   : > { %v1817_v3 = vpop.eup %1816 }
 0x98c   : > { %1225 = vrot.lane.b32.xlu1 %v1817_v3, %s2052_s29 }
 0x98f   : > { %v1819_v14 = vpop.eup %1818 }
 0x990   : > { %1131 = vrot.lane.b32.xlu0 %v1819_v14, %s2052_s29  ;;  %v1821_v2 = vpop.eup %1820 }
 0x991   : > { %v1219_v5 = vadd.f32 1.0, %v1821_v2  ;;  %v1823_v16 = vpop.eup %1822 }
 0x992   : > { %v1125_v17 = vadd.f32 1.0, %v1823_v16 }
 0x993   : > { %1824 = vrcp.f32 %v1219_v5 }
 0x994   : > { %1826 = vrcp.f32 %v1125_v17 }
 0x99d   : > { %v2535_v19 = vpop.eup %1824 }
 0x99e   : > { %v2540_v25 = vpop.eup %1826 }
 0x9fe   : > { %v1226_v20 = vpop.permute.xlu1 %1225 }
 0x9ff   : > { %v1228_v22 = vmul.f32 %v2535_v19, %v1226_v20 }
 0xa01   : > { %1230 = vrot.lane.b32.xlu1 %v1228_v22, %s2050_s20 }
 0xa02   : > { %v1132_v27 = vpop.permute.xlu0 %1131 }
 0xa03   : > { %v1134_v30 = vmul.f32 %v2540_v25, %v1132_v27 }
 0xa05   : > { %1243 = vperm.xlu1 %1763, %v1241_v28   ;;  %1136 = vrot.lane.b32.xlu0 %v1134_v30, %s2050_s20 }
 0xa09   : > { %676 = vperm.xlu1 %1763, %v2333_v33   ;;  %1149 = vperm.xlu0 %1762, %v1147_v31   ;;  %v1223_v33 = vmul.f32 %v2535_v19, %v1057_v24 }
 0xa0d   : > { %1060 = vperm.xlu1 %1763, %v2473_v21   ;;  %868 = vperm.xlu0 %1762, %v2401_v29  }
 0xa11   : > { %563 = vperm.xlu1 %1763, %v2337_v37   ;;  %1250 = vperm.xlu0 %1762, %v1166_v18   ;;  %v961_v37 = vsel %vm959_vm14, %v2501_v49, %v2497_v40 }
 0xa12   : > { %v1129_v29 = vmul.f32 %v2540_v25, %v961_v37 }
 0xa15   : > { %964 = vperm.xlu1 %1763, %v2477_v26   ;;  %772 = vperm.xlu0 %1762, %v2405_v34  }
 0xa19   : > { %1156 = vperm.xlu0 %1762, %v1550_v23  }
 0xa73   : > { %v1231_v32 = vpop.permute.xlu1 %1230 }
 0xa74   : > { %v1233_v36 = vadd.f32 %v1231_v32, %v1223_v33 }
 0xa76   : > { %1828 = vtanh.f32 %v1233_v36 }
 0xa77   : > { %v1137_v21 = vpop.permute.xlu0 %1136 }
 0xa78   : > { %v1139_v34 = vadd.f32 %v1137_v21, %v1129_v29 }
 0xa7a   : > { %1830 = vtanh.f32 %v1139_v34 }
 0xa80   : > { %v1829_v26 = vpop.eup %1828 }
 0xa81   : > { %1236 = vrot.lane.b32.xlu1 %v1829_v26, %s2052_s29 }
 0xa84   : > { %v1831_v38 = vpop.eup %1830  ;;  %v1244_v35 = vpop.permute.xlu1 %1243 }
 0xa85   : > { %1142 = vrot.lane.b32.xlu0 %v1831_v38, %s2052_s29  ;;  %vm1245_vm1 = vcmp.eq.s32.totalorder %v1244_v35, 1 }
 0xa86   : > { %v1247_v45 = vsel %vm1245_vm1, %v1233_v36, %v1057_v24 }
 0xa88   : > { %v677_v39 = vpop.permute.xlu1 %676  ;;  %v1150_v42 = vpop.permute.xlu0 %1149 }
 0xa89   : > { %v679_v44 = vmul.f32 %v677_v39, %v2369_v59  ;;  %vm1151_vm2 = vcmp.eq.s32.totalorder %v1150_v42, 1 }
 0xa8b   : > { %681 = vrot.lane.b32.xlu1 %v679_v44, %s2050_s20 }
 0xa8c   : > { %v1061_v40 = vpop.permute.xlu1 %1060  ;;  %v869_v49 = vpop.permute.xlu0 %868 }
 0xa8d   : > { %v1063_v41 = vmul.f32 %v1061_v40, %v2514_v47  ;;  %v871_v46 = vmul.f32 %v869_v49, %v2442_v55  ;;  %v1153_v55 = vsel %vm1151_vm2, %v1139_v34, %v961_v37 }
 0xa8f   : > { %1065 = vrot.lane.b32.xlu1 %v1063_v41, %s2050_s20  ;;  %873 = vrot.lane.b32.xlu0 %v871_v46, %s2050_s20 }
 0xa90   : > { %v564_v51 = vpop.permute.xlu1 %563  ;;  %v1251_v43 = vpop.permute.xlu0 %1250 }
 0xa91   : > { %v566_v48 = vmul.f32 %v564_v51, %v2377_v63 }
 0xa93   : > { %568 = vrot.lane.b32.xlu1 %v566_v48, %s2050_s20 }
 0xa94   : > { %v965_v52 = vpop.permute.xlu1 %964  ;;  %v773_v59 = vpop.permute.xlu0 %772 }
 0xa95   : > { %v967_v54 = vmul.f32 %v965_v52, %v2523_v50  ;;  %v775_v53 = vmul.f32 %v773_v59, %v2451_v60 }
 0xa97   : > { %969 = vrot.lane.b32.xlu1 %v967_v54, %s2050_s20  ;;  %777 = vrot.lane.b32.xlu0 %v775_v53, %s2050_s20 }
 0xa98   : > { %v1157_v63 = vpop.permute.xlu0 %1156 }
 0xa9b   : > { %1265 = vrot.lane.b32.xlu1 %v1153_v55, %s2053_s26  ;;  %1275 = vrot.lane.b32.xlu0 %v1247_v45, %s2053_s26 }
 0xaf3   : > { %v1237_v56 = vpop.permute.xlu1 %1236 }
 0xaf4   : > { %v1239_v57 = vmul.f32 %v2535_v19, %v1237_v56 }
 0xaf6   : > { %v1246_v60 = vsel %vm1245_vm1, %v1239_v57, %v2514_v47 }
 0xaf7   : > { %v1143_v58 = vpop.permute.xlu0 %1142  ;;  %v1253_v61 = vmul.f32 %v1251_v43, %v1246_v60 }
 0xaf8   : > { %v1145_v62 = vmul.f32 %v2540_v25, %v1143_v58 }
 0xaf9   : > { %1255 = vrot.lane.b32.xlu0 %v1253_v61, %s2050_s20 }
 0xafa   : > { %v1152_v0 = vsel %vm1151_vm2, %v1145_v62, %v2523_v50 }
 0xafb   : > { %1260 = vrot.lane.b32.xlu1 %v1152_v0, %s2050_s20  ;;  %v1159_v1 = vmul.f32 %v1157_v63, %v1152_v0 }
 0xafd   : > { %v682_v6 = vpop.permute.xlu1 %681  ;;  %1161 = vrot.lane.b32.xlu0 %v1159_v1, %s2050_s20 }
 0xafe   : > { %1529 = vst.msk [vmem:[%s2270_s22 + $0x6] sm:$0x3] %vm571_vm3, %v682_v6 }
 0xb01   : > { %v1066_v47 = vpop.permute.xlu1 %1065  ;;  %1270 = vrot.lane.b32.xlu0 %v1246_v60, %s2050_s20  ;;  %v874_v7 = vpop.permute.xlu0 %873 }
 0xb02   : > { %1549 = vst.msk [vmem:[%s2270_s22 + $0x2] sm:$0x3] %vm571_vm3, %v1066_v47  ;;  %1539 = vst.msk [vmem:[%s2270_s22 + $0x4] sm:$0x3] %vm571_vm3, %v874_v7 }
 0xb05   : > { %v569_v50 = vpop.permute.xlu1 %568 }
 0xb06   : > { %572 = vst.msk [vmem:[%s2268_s15] sm:$0x3] %vm571_vm3, %v569_v50 }
 0xb09   : > { %v970_v8 = vpop.permute.xlu1 %969  ;;  %v778_v9 = vpop.permute.xlu0 %777 }
 0xb0a   : > { %1544 = vst.msk [vmem:[%s2268_s15 + $0x4] sm:$0x3] %vm571_vm3, %v970_v8  ;;  %1534 = vst.msk [vmem:[%s2268_s15 + $0x2] sm:$0x3] %vm571_vm3, %v778_v9 }
 0xb0d   : > { %v1266_v10 = vpop.permute.xlu1 %1265  ;;  %v1276_v11 = vpop.permute.xlu0 %1275 }
 0xb0e   : > { %1268 = vst.msk [vmem:[#allocation3] sm:$0x3] %vm571_vm3, %v1266_v10  ;;  %1279 = vst.msk [vmem:[#allocation12] sm:$0x3] %vm571_vm3, %v1266_v10 }
 0xb0f   : > { %1278 = vst.msk [vmem:[#allocation5] sm:$0x3] %vm571_vm3, %v1276_v11  ;;  %1280 = vst.msk [vmem:[#allocation13] sm:$0x3] %vm571_vm3, %v1276_v11 }
 0xb10   : > { %1873 = shalt.err (!%p1870_p7)
}
 0xb11   : > { %s1874_s27 = scalar_lea.hbm %s2774_s9, 32  ;;  %p2817_p2 = pmov %p2816_p1 }
 0xb12   : > { %p1875_p4 = scmp.ne.s32.totalorder %s2774_s9, %s1874_s27  ;;  %p1880_p6 = scmp.lt.u32.totalorder %s1874_s27, %s2774_s9 }
 0xb14   : > { %p1876_p0 = pnand %p1875_p4, %p2817_p2 }
 0xb16   : > { %p1877_p5 = pneg %p1876_p0 }
 0xb18   : > { %p1882_p11 = pnand %p1880_p6, %p1877_p5 }
 0xb1a   : > { %1885 = shalt.err (!%p1882_p11)
}
 0xb1b   : > { %p2818_p12 = pmov %p2816_p1  ;;  %s1286_s18 = sand.u32 1, %s2145_s16  }
 0xb1c   : > { %s2819_s29 = ssub.s32 1, %s2145_s16  ;;  %s1317_s24 = sshll.u32 %s2270_s22, 4  ;;  %s2631_s24 = int_to_ptr.vmem [resolvable:$true] %s1317_s24 }
 0xb1d   : > { %1668 = dma.vmem_to_hbm [thread:$0]  (%p2818_p12), %s1343_s11, 32, %s2774_s9, [#allocation14]  }
 0xb1e   : > { %s1570_s26 = sshll.u32 %s2819_s29, 7  ;;  %s2055_s25 = smov [#allocation12]  }
 0xb1f   : > { %s1331_s30 = sshll.u32 %s2055_s25, 4  ;;  %s1569_s14 = sshll.u32 %s2145_s16, 7  ;;  %s2633_s30 = int_to_ptr.vmem [resolvable:$true] %s1331_s30 }
 0xb20   : > { %s1300_s27 = sshll.u32 %s2268_s15, 4  ;;  %s2629_s21 = scalar_lea.hbm %s2772_s7, %s1570_s26  ;;  %s2642_s27 = int_to_ptr.vmem [resolvable:$true] %s1300_s27 }
 0xb21   : > { %s2640_s10 = scalar_lea.hbm %s2771_s6, %s1569_s14  ;;  %s2644_s12 = scalar_lea.sflag [#allocation11], %s1286_s18 }
 0xb22   : > { %s1886_s29 = scalar_lea.vmem %s2631_s24, 128  ;;  %p2820_p3 = scmp.ne.s32.totalorder %s2806_s19, 0 }
 0xb23   : > { %p1887_p1 = scmp.ne.s32.totalorder %s2631_s24, %s1886_s29  ;;  %s2056_s26 = smov [#allocation10]  }
 0xb24   : > { %s1890_s25 = sshll.u32 %s2056_s26, 4  ;;  %s1891_s25 = int_to_ptr.vmem [resolvable:$false] %s1890_s25 }
 0xb25   : > { %p1888_p8 = pnand %p1887_p1, %p2820_p3  ;;  %s1892_s28 = scalar_lea.vmem %s1891_s25, 256 }
 0xb26   : > { %p1893_p10 = scmp.lt.s32.totalorder %s2631_s24, %s1891_s25  ;;  %p1894_p13 = scmp.lt.s32.totalorder %s1892_s28, %s1886_s29 }
 0xb27   : > { %p1889_p9 = pneg %p1888_p8 }
 0xb28   : > { %p1895_p7 = por %p1894_p13, %p1893_p10 }
 0xb2a   : > { %p1896_p4 = pnand %p1895_p7, %p1889_p9 }
 0xb6b   : > { %v1256_v12 = vpop.permute.xlu0 %1255 }
 0xb6c   : > { %1258 = vst.msk [vmem:[%s2270_s22] sm:$0x3] %vm571_vm3, %v1256_v12 }
 0xb6d   : > { %v1261_v13 = vpop.permute.xlu1 %1260 }
 0xb6e   : > { %1899 = shalt.err (!%p1896_p4)
}
 0xb6f   : > { %s1900_s22 = scalar_lea.hbm %s2629_s21, 128  ;;  %s1904_s17 = scalar_lea.hbm %s2772_s7, 256 }
 0xb70   : > { %p1901_p2 = scmp.ne.s32.totalorder %s2629_s21, %s1900_s22  ;;  %p1905_p6 = scmp.lt.u32.totalorder %s2629_s21, %s2772_s7 }
 0xb71   : > { %p1906_p11 = scmp.lt.u32.totalorder %s1904_s17, %s1900_s22  ;;  %p1908_p1 = scmp.lt.u32.totalorder %s1900_s22, %s2629_s21 }
 0xb72   : > { %p1902_p0 = pnand %p1901_p2, %p2820_p3 }
 0xb73   : > { %p1907_p12 = por %p1906_p11, %p1905_p6 }
 0xb74   : > { %p1903_p5 = pneg %p1902_p0 }
 0xb75   : > { %p1909_p8 = por %p1908_p1, %p1907_p12 }
 0xb77   : > { %p1910_p9 = pnand %p1909_p8, %p1903_p5 }
 0xb79   : > { %1913 = shalt.err (!%p1910_p9)
}
 0xb7a   : > { %s2057_s29 = smov 2   ;;  %1263 = vst.msk [vmem:[#allocation2] sm:$0x3] %vm571_vm3, %v1261_v13  ;;  %s1914_s26 = scalar_lea.vmem %s2633_s30, 32 }
 0xb7b   : > { %1664 = dma.vmem_to_hbm [thread:$0]  (%p2820_p3), %s2631_s24, 128, %s2629_s21, %s2644_s12, %s2050_s20, %s2050_s20, %s2057_s29  }
 0xb7c   : > { %p1915_p10 = scmp.ne.s32.totalorder %s2633_s30, %s1914_s26  ;;  %p2821_p13 = scmp.eq.s32.totalorder %s2145_s16, 1 }
 0xb7d   : > { %p1921_p2 = scmp.lt.s32.totalorder %s2633_s30, %s2633_s30  ;;  %p1922_p0 = scmp.lt.s32.totalorder %s1914_s26, %s1914_s26 }
 0xb7e   : > { %p1916_p7 = pnand %p1915_p10, %p2821_p13 }
 0xb7f   : > { %p1923_p5 = por %p1922_p0, %p1921_p2 }
 0xb80   : > { %p1917_p4 = pneg %p1916_p7 }
 0xb82   : > { %p1924_p6 = pnand %p1923_p5, %p1917_p4 }
 0xb84   : > { %1927 = shalt.err (!%p1924_p6)
}
 0xb85   : > { %s1928_s28 = scalar_lea.hbm %s2773_s8, 32  ;;  %p2822_p11 = pmov %p2821_p13 }
 0xb86   : > { %p1929_p3 = scmp.ne.s32.totalorder %s2773_s8, %s1928_s28  ;;  %p1934_p8 = scmp.lt.u32.totalorder %s1928_s28, %s2773_s8 }
 0xb88   : > { %p1930_p12 = pnand %p1929_p3, %p2822_p11 }
 0xb8a   : > { %p1931_p1 = pneg %p1930_p12 }
 0xb8c   : > { %p1936_p9 = pnand %p1934_p8, %p1931_p1 }
 0xb8e   : > { %1939 = shalt.err (!%p1936_p9)
}
 0xb8f   : > { %p2823_p10 = pmov %p2822_p11  ;;  %v1162_v3 = vpop.permute.xlu0 %1161  ;;  %s2824_s17 = sand.u32 1, %s2034_s13  }
 0xb90   : > { %1554 = vst.msk [vmem:[%s2268_s15 + $0x6] sm:$0x3] %vm571_vm3, %v1162_v3  ;;  %s2699_s11 = scalar_lea.sflag [#allocation8], %s2824_s17  ;;  %s1940_s5 = scalar_lea.vmem %s2642_s27, 128 }
 0xb91   : > { %1666 = dma.vmem_to_hbm [thread:$0]  (%p2823_p10), %s2633_s30, 32, %s2773_s8, [#allocation11]  }
 0xb92   : > { %p1941_p13 = scmp.ne.s32.totalorder %s2642_s27, %s1940_s5  ;;  %p2825_p7 = scmp.ne.s32.totalorder %s2802_s23, 0 }
 0xb93   : > { %s2058_s26 = smov [#allocation9]  }
 0xb94   : > { %p1942_p4 = pnand %p1941_p13, %p2825_p7  ;;  %s1944_s19 = sshll.u32 %s2058_s26, 4  ;;  %s1945_s19 = int_to_ptr.vmem [resolvable:$false] %s1944_s19 }
 0xb95   : > { %s1946_s25 = scalar_lea.vmem %s1945_s19, 256  ;;  %p1947_p0 = scmp.lt.s32.totalorder %s2642_s27, %s1945_s19 }
 0xb96   : > { %p1943_p2 = pneg %p1942_p4  ;;  %p1948_p5 = scmp.lt.s32.totalorder %s1946_s25, %s1940_s5 }
 0xb98   : > { %p1949_p6 = por %p1948_p5, %p1947_p0 }
 0xb9a   : > { %p1950_p3 = pnand %p1949_p6, %p1943_p2 }
 0xb9c   : > { %1953 = shalt.err (!%p1950_p3)
}
 0xb9d   : > { %s1954_s15 = scalar_lea.hbm %s2640_s10, 128  ;;  %s1958_s22 = scalar_lea.hbm %s2771_s6, 256 }
 0xb9e   : > { %p1955_p11 = scmp.ne.s32.totalorder %s2640_s10, %s1954_s15  ;;  %p1959_p8 = scmp.lt.u32.totalorder %s2640_s10, %s2771_s6 }
 0xb9f   : > { %p1960_p9 = scmp.lt.u32.totalorder %s1958_s22, %s1954_s15  ;;  %p1962_p13 = scmp.lt.u32.totalorder %s1954_s15, %s2640_s10 }
 0xba0   : > { %p1956_p12 = pnand %p1955_p11, %p2825_p7 }
 0xba1   : > { %p1961_p10 = por %p1960_p9, %p1959_p8 }
 0xba2   : > { %p1957_p1 = pneg %p1956_p12 }
 0xba3   : > { %p1963_p4 = por %p1962_p13, %p1961_p10 }
 0xba5   : > { %p1964_p2 = pnand %p1963_p4, %p1957_p1 }
 0xba7   : > { %1967 = shalt.err (!%p1964_p2)
}
 0xba8   : > { %1663 = dma.vmem_to_hbm [thread:$0]  (%p2825_p7), %s2642_s27, 128, %s2640_s10, %s2699_s11, %s2050_s20, %s2050_s20, %s2057_s29   ;;  %v1271_v14 = vpop.permute.xlu0 %1270 }
 0xba9   : > { %1273 = vst.msk [vmem:[#allocation4] sm:$0x3] %vm571_vm3, %v1271_v14  ;;  %p2826_p0 = scmp.eq.s32.totalorder %s2145_s16, 1 }
 0xbab   : > { %2001 = dma.done.wait (%p2826_p0), [#allocation11], 32   ;;  %p2827_p5 = pmov %p2826_p0 }
 0xbac   : > { %p2828_p6 = pmov %p2826_p0 }
 0xbad   : > { %2003 = vsyncadd (%p2827_p5), [#allocation11], 4294967264 }
 0xbae   : > { %2005 = dma.done.wait (%p2828_p6), [#allocation14], 32   ;;  %p2829_p3 = pmov %p2826_p0 }
 0xbb0   : > { %2007 = vsyncadd (%p2829_p3), [#allocation14], 4294967264 }
 0xbb1 PF: > { %s2830_s23 = sld [smem:[#allocation24_spill]]  ;;  %s2831_s12 = sld [smem:[#allocation22_spill]] }
 0xbb2   : > { %s2832_s18 = sld [smem:[#allocation27_spill]] }
 0xbb7   : > { %p1692_p11 = scmp.ge.s32.totalorder %s2830_s23, 2  ;;  %s1362_s20 = sand.u32 1, %s2831_s12  }
 0xbb8   : > { %p2833_p7 = scmp.ne.s32.totalorder %s2832_s18, 0  ;;  %s1363_s27 = scalar_lea.sflag [#allocation8], %s1362_s20 }
 0xbba   : > { %p1680_p12 = pnand %p1692_p11, %p2833_p7 }
 0xbbc   : > { %2009 = dma.done.wait (!%p1680_p12), %s1363_s27, 128  }
 0xbbd   : > { %2011 = vsyncadd (!%p1680_p12), %s1363_s27, 4294967168  ;;  %s2834_s10 = sadd.s32 4294967294, %s2830_s23   ;;  %s2835_s29 = sld [smem:[#allocation29_spill]] }
 0xbbe   : > { %s1371_s14 = sand.u32 1, %s2834_s10  }
 0xbbf   : > { %s1372_s17 = scalar_lea.sflag [#allocation11], %s1371_s14 }
 0xbc3   : > { %p2836_p1 = scmp.ne.s32.totalorder %s2835_s29, 0 }
 0xbc5   : > { %p1683_p8 = pnand %p1692_p11, %p2836_p1 }
 0xbc7   : > { %2013 = dma.done.wait (!%p1683_p8), %s1372_s17, 128  }
 0xbc8   : > { %2015 = vsyncadd (!%p1683_p8), %s1372_s17, 4294967168  ;;  %s2837_s15 = sld [smem:[#allocation25_spill]]  ;;  %s2838_s30 = sld [smem:[#allocation20_spill]] }
 0xbc9   : > { %s2839_s10 = sld [smem:[#allocation21_spill]]  ;;  %s2840_s11 = sld [smem:[#allocation28_spill]] }
 0xbca   : > { %s2841_s16 = sld [smem:[#allocation23_spill]]  ;;  %s2842_s14 = sld [smem:[#allocation26_spill]] }
 0xbcb   : > { %s2843_s12 = smov %s2034_s13 }
 0xbce   : > { %p25_p9 = scmp.ge.s32.totalorder %s2837_s15, 4  }
 0xbd0   : > { %s2844_s13 = smov %s2841_s16  ;;  %27 = sbr.rel (!%p25_p9) target bundleno = 11 (0xb), region = 148 }
 0xbd7   :  { %1377 = vsyncpa [#allocation7], 1 }
 0xbd8   :  { %1379 = vsyncpa [#allocation7 + $0x1], 1 }
 0xbd9   :  { %1380 = vsyncpa [#allocation8], 1 }
 0xbda   :  { %1382 = vsyncpa [#allocation8 + $0x1], 1 }
 0xbdb   :  { %1383 = vsyncpa [#allocation11], 1 }
 0xbdc   :  { %1385 = vsyncpa [#allocation11 + $0x1], 1 }
 0xbdd   :  { %1386 = vsyncpa [#allocation14], 1 }

</bundles_post_ra>
